<compile_context>
chip_gen: v7x
topology: tpu7x:2x2x1
jax: 0.10.0
libtpu: 0.0.40
codegen_flags: <defaults>
</compile_context>

<pallas_src>
import jax
import jax.numpy as jnp
from jax.experimental import pallas as pl
from jax.experimental.pallas import tpu as pltpu

LANE = 128   # vreg lane width
SUB = 8      # f32 sublane height


def _round_up(v, m):
    return ((v + m - 1) // m) * m


# -----------------------------------------------------------------------------
# Kernel: fused 3-layer MLP on one batch tile.
# Weights arrive pre-transposed to (in, out): every layer is a clean
# (tb, K) x (K, N) MXU feed (no in-kernel XLU transpose). Accumulation is f32
# via preferred_element_type; bias add + ReLU run in f32 on the VPU; the
# inter-layer activation is cast back to the MXU compute dtype.
# -----------------------------------------------------------------------------
def _mlp_kernel(x_ref, w1_ref, b1_ref, w2_ref, b2_ref, w3_ref, b3_ref, o_ref):
    h = jnp.dot(x_ref[...], w1_ref[...], preferred_element_type=jnp.float32)
    h = jnp.maximum(h + b1_ref[...], 0.0)
    h = jnp.dot(h.astype(w2_ref.dtype), w2_ref[...],
                preferred_element_type=jnp.float32)
    h = jnp.maximum(h + b2_ref[...], 0.0)
    out = jnp.dot(h.astype(w3_ref.dtype), w3_ref[...],
                  preferred_element_type=jnp.float32)
    o_ref[...] = (out + b3_ref[...]).astype(o_ref.dtype)


# -----------------------------------------------------------------------------
# One-time parameter preparation (call once when params are created / loaded).
# Accepts PyTorch nn.Linear layout: w (out, in), b (out,) or (1, out).
# Zero padding is exact: padded weight rows/cols and biases are 0, ReLU(0)=0.
# -----------------------------------------------------------------------------
def prepare_params(params, compute_dtype=jnp.bfloat16):
    w1, w3 = params["w1"], params["w3"]
    D_in, H, C = w1.shape[1], w1.shape[0], w3.shape[0]
    Dp, Hp, Cp = (_round_up(v, LANE) for v in (D_in, H, C))

    def prep_w(w, rows, cols):
        wt = jnp.asarray(w, jnp.float32).T                      # (in, out)
        wt = jnp.pad(wt, ((0, rows - wt.shape[0]), (0, cols - wt.shape[1])))
        return wt.astype(compute_dtype)

    def prep_b(b, cols):
        b2d = jnp.asarray(b, jnp.float32).reshape(1, -1)        # (out,) or (1,out)
        return jnp.pad(b2d, ((0, 0), (0, cols - b2d.shape[1])))  # stays f32

    return {
        "w1": prep_w(params["w1"], Dp, Hp), "b1": prep_b(params["b1"], Hp),
        "w2": prep_w(params["w2"], Hp, Hp), "b2": prep_b(params["b2"], Hp),
        "w3": prep_w(params["w3"], Hp, Cp), "b3": prep_b(params["b3"], Cp),
        "dims": (D_in, H, C, Dp, Hp, Cp),
        "compute_dtype": compute_dtype,
    }


# -----------------------------------------------------------------------------
# Forward pass.  `prepped` comes from prepare_params().
#   batch_tile: rows per grid step; sweep {512, 1024, 2048} for large batches.
#   x_buffers:  optional buffer count for the x stream (e.g. 3 if xprof shows
#               exposed input DMA on long grids, v6e).
#   out_dtype:  jnp.float32 logits by default; pass prepped["compute_dtype"]
#               to halve output writeback if the consumer only needs argmax.
# -----------------------------------------------------------------------------
def mlp_forward(x, prepped, *, batch_tile=1024, out_dtype=jnp.float32,
                x_buffers=None):
    D_in, H, C, Dp, Hp, Cp = prepped["dims"]
    cdt = prepped["compute_dtype"]
    B = x.shape[0]
    assert x.shape[1] == D_in

    # Batch tile: sublane-aligned, as large as requested, but capped so the
    # grid has >= 2 steps whenever possible (dual-TC v7x; free on v5e/v6e).
    tb = max(SUB, _round_up(min(batch_tile, B), SUB))
    half = max(SUB, _round_up((B + 1) // 2, SUB))
    tb = min(tb, half)
    Bp = _round_up(B, tb)
    grid = (Bp // tb,)

    # Single fused pad in the compute dtype (no f32 intermediate copy).
    xp = jnp.pad(x.astype(cdt), ((0, Bp - B), (0, Dp - D_in)))

    batch_map = lambda i: (i, 0)
    rep_map = lambda i: (0, 0)   # loop-invariant weights/biases, VMEM-resident

    def build_specs(plain):
        def rep_spec(shape):
            if not plain:
                return pl.BlockSpec(shape, rep_map, pipeline_mode=pl.Buffered(1))
            return pl.BlockSpec(shape, rep_map)

        if not plain and x_buffers is not None:
            x_spec = pl.BlockSpec((tb, Dp), batch_map,
                                  pipeline_mode=pl.Buffered(x_buffers))
        else:
            x_spec = pl.BlockSpec((tb, Dp), batch_map)

        in_specs = [x_spec,
                    rep_spec((Dp, Hp)), rep_spec((1, Hp)),
                    rep_spec((Hp, Hp)), rep_spec((1, Hp)),
                    rep_spec((Hp, Cp)), rep_spec((1, Cp))]
        out_spec = pl.BlockSpec((tb, Cp), batch_map)
        return in_specs, out_spec

    def call(plain):
        in_specs, out_spec = build_specs(plain)
        return pl.pallas_call(
            _mlp_kernel,
            out_shape=jax.ShapeDtypeStruct((Bp, Cp), out_dtype),
            grid_spec=pltpu.PrefetchScalarGridSpec(
                num_scalar_prefetch=0,
                grid=grid,
                in_specs=in_specs,
                out_specs=out_spec,
            ),
            compiler_params=pltpu.CompilerParams(
                dimension_semantics=("parallel",),
            ),
        )(xp, prepped["w1"], prepped["b1"], prepped["w2"], prepped["b2"],
          prepped["w3"], prepped["b3"])

    try:
        out = call(plain=False)          # single-buffer resident weights
    except Exception:
        out = call(plain=True)           # fallback: default double-buffering

    return out[:B, :C]


# -----------------------------------------------------------------------------
# Test scaffolding (PyTorch nn.Linear-style params + pure-JAX reference).
# -----------------------------------------------------------------------------
def init_params(key, n_inputs, n_hiddens, n_outputs):
    """PyTorch nn.Linear init: U(-1/sqrt(fan_in), 1/sqrt(fan_in)); bias is (out,)."""
    ks = jax.random.split(key, 6)

    def lin(kw, kb, fan_out, fan_in):
        bound = 1.0 / jnp.sqrt(jnp.float32(fan_in))
        w = jax.random.uniform(kw, (fan_out, fan_in), jnp.float32, -bound, bound)
        b = jax.random.uniform(kb, (fan_out,), jnp.float32, -bound, bound)
        return w, b

    w1, b1 = lin(ks[0], ks[1], n_hiddens, n_inputs)
    w2, b2 = lin(ks[2], ks[3], n_hiddens, n_hiddens)
    w3, b3 = lin(ks[4], ks[5], n_outputs, n_hiddens)
    return {"w1": w1, "b1": b1, "w2": w2, "b2": b2, "w3": w3, "b3": b3}


def mlp_reference(x, p):
    h = jnp.maximum(x @ p["w1"].T + p["b1"], 0.0)
    h = jnp.maximum(h @ p["w2"].T + p["b2"], 0.0)
    return h @ p["w3"].T + p["b3"]


# TODO(synk): Net.observe() (SGD step, cross-entropy, KL/Euclidean distillation
# losses, memory bookkeeping) is training logic, not part of the forward pass,
# and is not implemented as a kernel.

if __name__ == "__main__":
    # Shapes consistent with the MNIST branch of Net:
    #   n_inputs=784, n_layers=2, n_hiddens=100, n_outputs=10, small batch=64.
    B, D_in, H, C = 64, 784, 100, 10

    key = jax.random.PRNGKey(0)
    kx, kp = jax.random.split(key)
    x = jax.random.normal(kx, (B, D_in), dtype=jnp.float32)
    params = init_params(kp, D_in, H, C)

    ref = mlp_reference(x, params)

    # Exact f32 compute path (tight correctness check).
    prepped_f32 = prepare_params(params, compute_dtype=jnp.float32)
    out_f32 = jax.block_until_ready(mlp_forward(x, prepped_f32))
    assert out_f32.shape == (B, C)
    assert jnp.allclose(out_f32, ref, atol=1e-4, rtol=1e-4)

    # Production bf16 MXU path: params prepped ONCE, forward reused.
    prepped = prepare_params(params)                      # bf16 default
    out_bf16 = jax.block_until_ready(mlp_forward(x, prepped))
    out_bf16_again = jax.block_until_ready(mlp_forward(x, prepped))
    assert out_bf16.shape == (B, C)
    assert jnp.allclose(out_bf16, ref, atol=5e-2, rtol=5e-2)
    assert jnp.allclose(out_bf16, out_bf16_again)

    print("KERNEL_OK")
</pallas_src>

<mosaic_0001>
module attributes {stable_mosaic.version = 11 : i64} {
  func.func @_mlp_kernel(%arg0: i32, %arg1: memref<32x896xf32, #tpu.memory_space<vmem>>, %arg2: memref<896x128xf32, #tpu.memory_space<vmem>>, %arg3: memref<1x128xf32, #tpu.memory_space<vmem>>, %arg4: memref<128x128xf32, #tpu.memory_space<vmem>>, %arg5: memref<1x128xf32, #tpu.memory_space<vmem>>, %arg6: memref<128x128xf32, #tpu.memory_space<vmem>>, %arg7: memref<1x128xf32, #tpu.memory_space<vmem>>, %arg8: memref<32x128xf32, #tpu.memory_space<vmem>>) attributes {dimension_semantics = [#tpu.dimension_semantics<parallel>], iteration_bounds = array<i64: 2>, scalar_prefetch = 0 : i64, scratch_operands = 0 : i64, tpu.core_type = #tpu.core_type<tc>, window_params = [{transform_indices = @transform_0, window_bounds = array<i64: 32, 896>}, {pipeline_mode = #tpu.pipeline_mode<synchronous>, transform_indices = @transform_1, window_bounds = array<i64: 896, 128>}, {pipeline_mode = #tpu.pipeline_mode<synchronous>, transform_indices = @transform_2, window_bounds = array<i64: 1, 128>}, {pipeline_mode = #tpu.pipeline_mode<synchronous>, transform_indices = @transform_3, window_bounds = array<i64: 128, 128>}, {pipeline_mode = #tpu.pipeline_mode<synchronous>, transform_indices = @transform_4, window_bounds = array<i64: 1, 128>}, {pipeline_mode = #tpu.pipeline_mode<synchronous>, transform_indices = @transform_5, window_bounds = array<i64: 128, 128>}, {pipeline_mode = #tpu.pipeline_mode<synchronous>, transform_indices = @transform_6, window_bounds = array<i64: 1, 128>}, {transform_indices = @transform_7, window_bounds = array<i64: 32, 128>}]} {
    %c0 = arith.constant 0 : index
    %c0_0 = arith.constant 0 : index
    %0 = vector.load %arg1[%c0, %c0_0] : memref<32x896xf32, #tpu.memory_space<vmem>>, vector<32x896xf32>
    %c0_1 = arith.constant 0 : index
    %c0_2 = arith.constant 0 : index
    %1 = vector.load %arg2[%c0_1, %c0_2] : memref<896x128xf32, #tpu.memory_space<vmem>>, vector<896x128xf32>
    %cst = arith.constant dense<0.000000e+00> : vector<32x128xf32>
    %2 = tpu.matmul %0, %1, %cst {dimension_numbers = #tpu.dot_dimension_numbers<[1], [0], [0], [1], [0, 0, 1, 1], [], []>} : vector<32x896xf32>, vector<896x128xf32>, vector<32x128xf32> -> vector<32x128xf32>
    %c0_3 = arith.constant 0 : index
    %c0_4 = arith.constant 0 : index
    %3 = vector.load %arg3[%c0_3, %c0_4] : memref<1x128xf32, #tpu.memory_space<vmem>>, vector<1x128xf32>
    %4 = vector.broadcast %3 : vector<1x128xf32> to vector<32x128xf32>
    %5 = arith.addf %2, %4 : vector<32x128xf32>
    %cst_5 = arith.constant 0.000000e+00 : f32
    %6 = vector.broadcast %cst_5 : f32 to vector<32x128xf32>
    %7 = arith.maximumf %5, %6 : vector<32x128xf32>
    %c0_6 = arith.constant 0 : index
    %c0_7 = arith.constant 0 : index
    %8 = vector.load %arg4[%c0_6, %c0_7] : memref<128x128xf32, #tpu.memory_space<vmem>>, vector<128x128xf32>
    %cst_8 = arith.constant dense<0.000000e+00> : vector<32x128xf32>
    %9 = tpu.matmul %7, %8, %cst_8 {dimension_numbers = #tpu.dot_dimension_numbers<[1], [0], [0], [1], [0, 0, 1, 1], [], []>} : vector<32x128xf32>, vector<128x128xf32>, vector<32x128xf32> -> vector<32x128xf32>
    %c0_9 = arith.constant 0 : index
    %c0_10 = arith.constant 0 : index
    %10 = vector.load %arg5[%c0_9, %c0_10] : memref<1x128xf32, #tpu.memory_space<vmem>>, vector<1x128xf32>
    %11 = vector.broadcast %10 : vector<1x128xf32> to vector<32x128xf32>
    %12 = arith.addf %9, %11 : vector<32x128xf32>
    %cst_11 = arith.constant 0.000000e+00 : f32
    %13 = vector.broadcast %cst_11 : f32 to vector<32x128xf32>
    %14 = arith.maximumf %12, %13 : vector<32x128xf32>
    %c0_12 = arith.constant 0 : index
    %c0_13 = arith.constant 0 : index
    %15 = vector.load %arg6[%c0_12, %c0_13] : memref<128x128xf32, #tpu.memory_space<vmem>>, vector<128x128xf32>
    %cst_14 = arith.constant dense<0.000000e+00> : vector<32x128xf32>
    %16 = tpu.matmul %14, %15, %cst_14 {dimension_numbers = #tpu.dot_dimension_numbers<[1], [0], [0], [1], [0, 0, 1, 1], [], []>} : vector<32x128xf32>, vector<128x128xf32>, vector<32x128xf32> -> vector<32x128xf32>
    %c0_15 = arith.constant 0 : index
    %c0_16 = arith.constant 0 : index
    %17 = vector.load %arg7[%c0_15, %c0_16] : memref<1x128xf32, #tpu.memory_space<vmem>>, vector<1x128xf32>
    %18 = vector.broadcast %17 : vector<1x128xf32> to vector<32x128xf32>
    %19 = arith.addf %16, %18 : vector<32x128xf32>
    %c0_17 = arith.constant 0 : index
    %c0_18 = arith.constant 0 : index
    %20 = vector.load %arg8[%c0_17, %c0_18] : memref<32x128xf32, #tpu.memory_space<vmem>>, vector<32x128xf32>
    tpu.vector_store %arg8[%c0_17, %c0_18], %19 {strides = array<i32>} : memref<32x128xf32, #tpu.memory_space<vmem>>, vector<32x128xf32>,
    return
  }
  func.func @transform_0(%arg0: i32) -> (i32, i32) {
    %c0_i32 = arith.constant 0 : i32
    %c0_i32_0 = arith.constant 0 : i32
    return %arg0, %c0_i32 : i32, i32
  }
  func.func @transform_1(%arg0: i32) -> (i32, i32) {
    %c0_i32 = arith.constant 0 : i32
    %c0_i32_0 = arith.constant 0 : i32
    %c0_i32_1 = arith.constant 0 : i32
    return %c0_i32, %c0_i32_0 : i32, i32
  }
  func.func @transform_2(%arg0: i32) -> (i32, i32) {
    %c0_i32 = arith.constant 0 : i32
    %c0_i32_0 = arith.constant 0 : i32
    %c0_i32_1 = arith.constant 0 : i32
    return %c0_i32, %c0_i32_0 : i32, i32
  }
  func.func @transform_3(%arg0: i32) -> (i32, i32) {
    %c0_i32 = arith.constant 0 : i32
    %c0_i32_0 = arith.constant 0 : i32
    %c0_i32_1 = arith.constant 0 : i32
    return %c0_i32, %c0_i32_0 : i32, i32
  }
  func.func @transform_4(%arg0: i32) -> (i32, i32) {
    %c0_i32 = arith.constant 0 : i32
    %c0_i32_0 = arith.constant 0 : i32
    %c0_i32_1 = arith.constant 0 : i32
    return %c0_i32, %c0_i32_0 : i32, i32
  }
  func.func @transform_5(%arg0: i32) -> (i32, i32) {
    %c0_i32 = arith.constant 0 : i32
    %c0_i32_0 = arith.constant 0 : i32
    %c0_i32_1 = arith.constant 0 : i32
    return %c0_i32, %c0_i32_0 : i32, i32
  }
  func.func @transform_6(%arg0: i32) -> (i32, i32) {
    %c0_i32 = arith.constant 0 : i32
    %c0_i32_0 = arith.constant 0 : i32
    %c0_i32_1 = arith.constant 0 : i32
    return %c0_i32, %c0_i32_0 : i32, i32
  }
  func.func @transform_7(%arg0: i32) -> (i32, i32) {
    %c0_i32 = arith.constant 0 : i32
    %c0_i32_0 = arith.constant 0 : i32
    return %arg0, %c0_i32 : i32, i32
  }
}

module attributes {stable_mosaic.version = 11 : i64} {
  func.func @_mlp_kernel(%arg0: i32, %arg1: memref<32x896xf32, #tpu.memory_space<vmem>>, %arg2: memref<896x128xf32, #tpu.memory_space<vmem>>, %arg3: memref<1x128xf32, #tpu.memory_space<vmem>>, %arg4: memref<128x128xf32, #tpu.memory_space<vmem>>, %arg5: memref<1x128xf32, #tpu.memory_space<vmem>>, %arg6: memref<128x128xf32, #tpu.memory_space<vmem>>, %arg7: memref<1x128xf32, #tpu.memory_space<vmem>>, %arg8: memref<32x128xf32, #tpu.memory_space<vmem>>) attributes {dimension_semantics = [#tpu.dimension_semantics<parallel>], iteration_bounds = array<i64: 2>, scalar_prefetch = 0 : i64, scratch_operands = 0 : i64, tpu.core_type = #tpu.core_type<tc>, window_params = [{transform_indices = @transform_0, window_bounds = array<i64: 32, 896>}, {pipeline_mode = #tpu.pipeline_mode<synchronous>, transform_indices = @transform_1, window_bounds = array<i64: 896, 128>}, {pipeline_mode = #tpu.pipeline_mode<synchronous>, transform_indices = @transform_2, window_bounds = array<i64: 1, 128>}, {pipeline_mode = #tpu.pipeline_mode<synchronous>, transform_indices = @transform_3, window_bounds = array<i64: 128, 128>}, {pipeline_mode = #tpu.pipeline_mode<synchronous>, transform_indices = @transform_4, window_bounds = array<i64: 1, 128>}, {pipeline_mode = #tpu.pipeline_mode<synchronous>, transform_indices = @transform_5, window_bounds = array<i64: 128, 128>}, {pipeline_mode = #tpu.pipeline_mode<synchronous>, transform_indices = @transform_6, window_bounds = array<i64: 1, 128>}, {transform_indices = @transform_7, window_bounds = array<i64: 32, 128>}]} {
    %c0 = arith.constant 0 : index
    %c0_0 = arith.constant 0 : index
    %0 = vector.load %arg1[%c0, %c0_0] : memref<32x896xf32, #tpu.memory_space<vmem>>, vector<32x896xf32>
    %c0_1 = arith.constant 0 : index
    %c0_2 = arith.constant 0 : index
    %1 = vector.load %arg2[%c0_1, %c0_2] : memref<896x128xf32, #tpu.memory_space<vmem>>, vector<896x128xf32>
    %cst = arith.constant dense<0.000000e+00> : vector<32x128xf32>
    %2 = tpu.matmul %0, %1, %cst {dimension_numbers = #tpu.dot_dimension_numbers<[1], [0], [0], [1], [0, 0, 1, 1], [], []>} : vector<32x896xf32>, vector<896x128xf32>, vector<32x128xf32> -> vector<32x128xf32>
    %c0_3 = arith.constant 0 : index
    %c0_4 = arith.constant 0 : index
    %3 = vector.load %arg3[%c0_3, %c0_4] : memref<1x128xf32, #tpu.memory_space<vmem>>, vector<1x128xf32>
    %4 = vector.broadcast %3 : vector<1x128xf32> to vector<32x128xf32>
    %5 = arith.addf %2, %4 : vector<32x128xf32>
    %cst_5 = arith.constant 0.000000e+00 : f32
    %6 = vector.broadcast %cst_5 : f32 to vector<32x128xf32>
    %7 = arith.maximumf %5, %6 : vector<32x128xf32>
    %c0_6 = arith.constant 0 : index
    %c0_7 = arith.constant 0 : index
    %8 = vector.load %arg4[%c0_6, %c0_7] : memref<128x128xf32, #tpu.memory_space<vmem>>, vector<128x128xf32>
    %cst_8 = arith.constant dense<0.000000e+00> : vector<32x128xf32>
    %9 = tpu.matmul %7, %8, %cst_8 {dimension_numbers = #tpu.dot_dimension_numbers<[1], [0], [0], [1], [0, 0, 1, 1], [], []>} : vector<32x128xf32>, vector<128x128xf32>, vector<32x128xf32> -> vector<32x128xf32>
    %c0_9 = arith.constant 0 : index
    %c0_10 = arith.constant 0 : index
    %10 = vector.load %arg5[%c0_9, %c0_10] : memref<1x128xf32, #tpu.memory_space<vmem>>, vector<1x128xf32>
    %11 = vector.broadcast %10 : vector<1x128xf32> to vector<32x128xf32>
    %12 = arith.addf %9, %11 : vector<32x128xf32>
    %cst_11 = arith.constant 0.000000e+00 : f32
    %13 = vector.broadcast %cst_11 : f32 to vector<32x128xf32>
    %14 = arith.maximumf %12, %13 : vector<32x128xf32>
    %c0_12 = arith.constant 0 : index
    %c0_13 = arith.constant 0 : index
    %15 = vector.load %arg6[%c0_12, %c0_13] : memref<128x128xf32, #tpu.memory_space<vmem>>, vector<128x128xf32>
    %cst_14 = arith.constant dense<0.000000e+00> : vector<32x128xf32>
    %16 = tpu.matmul %14, %15, %cst_14 {dimension_numbers = #tpu.dot_dimension_numbers<[1], [0], [0], [1], [0, 0, 1, 1], [], []>} : vector<32x128xf32>, vector<128x128xf32>, vector<32x128xf32> -> vector<32x128xf32>
    %c0_15 = arith.constant 0 : index
    %c0_16 = arith.constant 0 : index
    %17 = vector.load %arg7[%c0_15, %c0_16] : memref<1x128xf32, #tpu.memory_space<vmem>>, vector<1x128xf32>
    %18 = vector.broadcast %17 : vector<1x128xf32> to vector<32x128xf32>
    %19 = arith.addf %16, %18 : vector<32x128xf32>
    %c0_17 = arith.constant 0 : index
    %c0_18 = arith.constant 0 : index
    %20 = vector.load %arg8[%c0_17, %c0_18] : memref<32x128xf32, #tpu.memory_space<vmem>>, vector<32x128xf32>
    tpu.vector_store %arg8[%c0_17, %c0_18], %19 {strides = array<i32>} : memref<32x128xf32, #tpu.memory_space<vmem>>, vector<32x128xf32>,
    return
  }
  func.func @transform_0(%arg0: i32) -> (i32, i32) {
    %c0_i32 = arith.constant 0 : i32
    %c0_i32_0 = arith.constant 0 : i32
    return %arg0, %c0_i32 : i32, i32
  }
  func.func @transform_1(%arg0: i32) -> (i32, i32) {
    %c0_i32 = arith.constant 0 : i32
    %c0_i32_0 = arith.constant 0 : i32
    %c0_i32_1 = arith.constant 0 : i32
    return %c0_i32, %c0_i32_0 : i32, i32
  }
  func.func @transform_2(%arg0: i32) -> (i32, i32) {
    %c0_i32 = arith.constant 0 : i32
    %c0_i32_0 = arith.constant 0 : i32
    %c0_i32_1 = arith.constant 0 : i32
    return %c0_i32, %c0_i32_0 : i32, i32
  }
  func.func @transform_3(%arg0: i32) -> (i32, i32) {
    %c0_i32 = arith.constant 0 : i32
    %c0_i32_0 = arith.constant 0 : i32
    %c0_i32_1 = arith.constant 0 : i32
    return %c0_i32, %c0_i32_0 : i32, i32
  }
  func.func @transform_4(%arg0: i32) -> (i32, i32) {
    %c0_i32 = arith.constant 0 : i32
    %c0_i32_0 = arith.constant 0 : i32
    %c0_i32_1 = arith.constant 0 : i32
    return %c0_i32, %c0_i32_0 : i32, i32
  }
  func.func @transform_5(%arg0: i32) -> (i32, i32) {
    %c0_i32 = arith.constant 0 : i32
    %c0_i32_0 = arith.constant 0 : i32
    %c0_i32_1 = arith.constant 0 : i32
    return %c0_i32, %c0_i32_0 : i32, i32
  }
  func.func @transform_6(%arg0: i32) -> (i32, i32) {
    %c0_i32 = arith.constant 0 : i32
    %c0_i32_0 = arith.constant 0 : i32
    %c0_i32_1 = arith.constant 0 : i32
    return %c0_i32, %c0_i32_0 : i32, i32
  }
  func.func @transform_7(%arg0: i32) -> (i32, i32) {
    %c0_i32 = arith.constant 0 : i32
    %c0_i32_0 = arith.constant 0 : i32
    return %arg0, %c0_i32 : i32, i32
  }
}

</mosaic_0001>

<bundles_post_ra>
// kernel: tpu_custom_call.1
= control target key start
LH: loop header
LB: loop body
LE: loop exit
PB: predicated region body
PF: predicated region fallthrough
CT: control target
= control target key end

     0   :  { %12 = vsyncpa [#allocation3], 0  ;;  %s2331_s0 = inlined_call_operand.hbm [shape: f32[64,896], index: 0, kind: input, shape index: {}]   ;;  %s2332_s1 = inlined_call_operand.hbm [shape: f32[896,128], index: 1, kind: input, shape index: {}]   ;;  %s2333_s2 = inlined_call_operand.vmem [shape: f32[1,128], index: 2, kind: input, shape index: {}]   ;;  %s2334_s3 = inlined_call_operand.hbm [shape: f32[128,128], index: 3, kind: input, shape index: {}]   ;;  %s2335_s4 = inlined_call_operand.vmem [shape: f32[1,128], index: 4, kind: input, shape index: {}]   ;;  %s2336_s5 = inlined_call_operand.hbm [shape: f32[128,128], index: 5, kind: input, shape index: {}]   ;;  %s2337_s6 = inlined_call_operand.vmem [shape: f32[1,128], index: 6, kind: input, shape index: {}]   ;;  %s2338_s7 = inlined_call_operand.hbm [shape: f32[64,128], index: 7, kind: output, shape index: {}]  }
   0x1   :  { %14 = vsyncpa [#allocation3 + $0x1], 0 }
   0x2   :  { %15 = vsyncpa [#allocation6], 0 }
   0x3   :  { %16 = vsyncpa [#allocation9], 0 }
   0x4   :  { %17 = vsyncpa [#allocation4], 0 }
   0x5   :  { %19 = vsyncpa [#allocation4 + $0x1], 0  ;;  %s2023_s24 = smov 0   ;;  %s2025_s25 = smov 0  }
   0x6   :  { %s2027_s26 = smov 0   ;;  %s2029_s27 = smov 0  }
   0x7 LB: > { %s2044_s28 = sadd.s32 4294967295, %s1970_s27   ;;  %s1175_s29 = sadd.s32 4294967294, %s1970_s27   ;;  %s1970_s27 = sphi %s2029_s27, %s2364_s27   ;;  %s1966_s26 = sphi %s2027_s26, %s2363_s26   ;;  %s1962_s25 = sphi %s2025_s25, %s2362_s25   ;;  %s1958_s24 = sphi %s2023_s24, %s2361_s24  }
   0x8   : > { %p45_p0 = scmp.ne.s32.totalorder %s1962_s25, %s1958_s24  ;;  %p2339_p1 = scmp.eq.s32.totalorder %s2044_s28, 0 }
   0x9   : > { %p201_p3 = scmp.eq.s32.totalorder %s1175_s29, 1  ;;  %p1176_p5 = scmp.ge.s32.totalorder %s1970_s27, 1 }
   0xa   : > { %p2053_p4 = por %p2339_p1, %p45_p0  ;;  %p208_p7 = scmp.lt.s32.totalorder %s1970_s27, 3 }
   0xb   : > { %p2058_p6 = por %p201_p3, %p45_p0  ;;  %s1972_s10 = smov [#allocation5]  }
   0xc   : > { %s2343_s30 = scalar_select %p2053_p4, 1, 0 }
   0xd   : > { %s2344_s8 = scalar_select %p2058_p6, 1, 0 }
   0xe   : > { %p2063_p8 = pnand %p1176_p5, %p208_p7  ;;  %s220_s11 = sshll.u32 %s1972_s10, 4  ;;  %s2067_s11 = int_to_ptr.vmem [resolvable:$true] %s220_s11 }
   0xf   : > { %2345 = sst [smem:[#allocation15_spill]] %s2344_s8  ;;  %s1973_s13 = smov [#allocation7]  }
  0x10   : > { %s2346_s9 = scalar_select %p2063_p8, 1, 0 }
  0x11   : > { %p1715_p9 = pneg %p2063_p8  ;;  %s236_s14 = sshll.u32 %s1973_s13, 4  ;;  %s2078_s14 = int_to_ptr.vmem [resolvable:$true] %s236_s14 }
  0x12   : > { %s1974_s15 = smov [#allocation8]   ;;  %s1782_s19 = scalar_lea.hbm %s2332_s1, 14336 }
  0x13   : > { %p2074_p11 = pnand %p1715_p9, %p2339_p1  ;;  %s2080_s16 = sshll.u32 %s1974_s15, 4  ;;  %s253_s16 = int_to_ptr.vmem [resolvable:$true] %s2080_s16 }
  0x14   : > { %p1783_p12 = scmp.ne.s32.totalorder %s2332_s1, %s1782_s19  ;;  %p1789_p5 = scmp.lt.u32.totalorder %s1782_s19, %s2332_s1 }
  0x15   : > { %p2090_p13 = pneg %p2074_p11 }
  0x17   : > { %p1785_p0 = pnand %p2090_p13, %p1783_p12 }
  0x19   : > { %p1786_p3 = pneg %p1785_p0 }
  0x1b   : > { %p1791_p7 = pnand %p1789_p5, %p1786_p3 }
  0x1d   : > { %1794 = shalt.err (!%p1791_p7)
}
  0x1e   : > { %s1795_s10 = scalar_lea.vmem %s2067_s11, 14336  ;;  %p1803_p2 = scmp.lt.s32.totalorder %s2067_s11, %s2067_s11 }
  0x1f   : > { %p1796_p9 = scmp.ne.s32.totalorder %s2067_s11, %s1795_s10  ;;  %p1804_p6 = scmp.lt.s32.totalorder %s1795_s10, %s1795_s10 }
  0x21   : > { %p1798_p10 = pnand %p1796_p9, %p2090_p13  ;;  %p1805_p12 = por %p1804_p6, %p1803_p2 }
  0x23   : > { %p1799_p1 = pneg %p1798_p10 }
  0x25   : > { %p1806_p0 = pnand %p1805_p12, %p1799_p1 }
  0x27   : > { %1809 = shalt.err (!%p1806_p0)
}
  0x28   : > { %s1975_s13 = smov 128   ;;  %s1976_s15 = smov 8  }
  0x29   : > { %1718 = dma.hbm_to_vmem [thread:$0]  (!%p2074_p11), %s2332_s1, 14336, %s2067_s11, [#allocation6], %s1975_s13, %s1975_s13, %s1976_s15  }
  0x2a   : > { %s1810_s21 = scalar_lea.hbm %s2334_s3, 2048 }
  0x2b   : > { %p1811_p1 = scmp.ne.s32.totalorder %s2334_s3, %s1810_s21  ;;  %p1817_p10 = scmp.lt.u32.totalorder %s1810_s21, %s2334_s3 }
  0x2d   : > { %p1813_p2 = pnand %p1811_p1, %p2090_p13 }
  0x2f   : > { %p1814_p6 = pneg %p1813_p2 }
  0x31   : > { %p1819_p3 = pnand %p1817_p10, %p1814_p6 }
  0x33   : > { %1822 = shalt.err (!%p1819_p3)
}
  0x34   : > { %s1823_s11 = scalar_lea.vmem %s2078_s14, 2048  ;;  %p1831_p12 = scmp.lt.s32.totalorder %s2078_s14, %s2078_s14 }
  0x35   : > { %p1824_p5 = scmp.ne.s32.totalorder %s2078_s14, %s1823_s11  ;;  %p1832_p0 = scmp.lt.s32.totalorder %s1823_s11, %s1823_s11 }
  0x37   : > { %p1826_p7 = pnand %p1824_p5, %p2090_p13  ;;  %p1833_p1 = por %p1832_p0, %p1831_p12 }
  0x39   : > { %p1827_p9 = pneg %p1826_p7 }
  0x3b   : > { %p1834_p2 = pnand %p1833_p1, %p1827_p9 }
  0x3d   : > { %1837 = shalt.err (!%p1834_p2)
}
  0x3e   : > { %1721 = dma.hbm_to_vmem [thread:$0]  (!%p2074_p11), %s2334_s3, 2048, %s2078_s14, [#allocation6], %s1975_s13, %s1975_s13, %s1976_s15  }
  0x3f   : > { %s1838_s20 = scalar_lea.hbm %s2336_s5, 2048 }
  0x40   : > { %p1839_p6 = scmp.ne.s32.totalorder %s2336_s5, %s1838_s20  ;;  %p1845_p5 = scmp.lt.u32.totalorder %s1838_s20, %s2336_s5 }
  0x42   : > { %p1841_p10 = pnand %p1839_p6, %p2090_p13 }
  0x44   : > { %p1842_p3 = pneg %p1841_p10 }
  0x46   : > { %p1847_p7 = pnand %p1845_p5, %p1842_p3 }
  0x48   : > { %1850 = shalt.err (!%p1847_p7)
}
  0x49   : > { %s1851_s11 = scalar_lea.vmem %s253_s16, 2048  ;;  %p1859_p1 = scmp.lt.s32.totalorder %s253_s16, %s253_s16 }
  0x4a   : > { %p1852_p9 = scmp.ne.s32.totalorder %s253_s16, %s1851_s11  ;;  %p1860_p2 = scmp.lt.s32.totalorder %s1851_s11, %s1851_s11 }
  0x4c   : > { %p1854_p12 = pnand %p1852_p9, %p2090_p13  ;;  %p1861_p4 = por %p1860_p2, %p1859_p1 }
  0x4e   : > { %p1855_p0 = pneg %p1854_p12 }
  0x50   : > { %p1862_p8 = pnand %p1861_p4, %p1855_p0 }
  0x52   : > { %1865 = shalt.err (!%p1862_p8)
}
  0x53   : > { %1724 = dma.hbm_to_vmem [thread:$0]  (!%p2074_p11), %s2336_s5, 2048, %s253_s16, [#allocation9], %s1975_s13, %s1975_s13, %s1976_s15  }
  0x54   : > { %s2163_s22 = sadd.s32 1, %s1970_s27   ;;  %s32_s17 = sadd.s32 1, %s1966_s26 }
  0x55   : > { %s29_s12 = ssub.s32 %s1970_s27, %s2163_s22  ;;  %p39_p8 = scmp.ne.s32.totalorder %s1966_s26, %s1962_s25 }
  0x56   : > { %p30_p4 = scmp.eq.s32.totalorder %s29_s12, 0  ;;  %p40_p13 = scmp.eq.s32.totalorder %s1970_s27, 0 }
  0x57   : > { %p1736_p6 = scmp.lt.s32.totalorder %s1970_s27, 2  ;;  %p2349_p3 = scmp.eq.s32.totalorder %s2044_s28, 1 }
  0x58   : > { %s2173_s18 = scalar_select %p30_p4, %s1966_s26, %s32_s17  }
  0x59   : > { %p41_p10 = por %p40_p13, %p39_p8  ;;  %p2177_p5 = por %p2349_p3, %p39_p8 }
  0x5a   : > { %s269_s20 = sand.u32 1, %s1966_s26   ;;  %s1697_s21 = smul.u32 3584, %s1970_s27 }
  0x5b   : > { %s1696_s16 = smul.u32 224, %s269_s20  ;;  %p2188_p11 = pnand %p1736_p6, %p41_p10 }
  0x5c   : > { %s2186_s23 = scalar_lea.hbm %s2331_s0, %s1697_s21  ;;  %s2194_s14 = scalar_lea.sflag [#allocation3], %s269_s20 }
  0x5d   : > { %s273_s10 = scalar_lea.vmem [#allocation2], %s1696_s16  ;;  %s1866_s8 = scalar_lea.hbm %s2186_s23, 3584 }
  0x5e   : > { %s281_s11 = sshll.u32 %s273_s10, 4  ;;  %p1867_p7 = scmp.ne.s32.totalorder %s2186_s23, %s1866_s8  ;;  %s2192_s11 = int_to_ptr.vmem [resolvable:$true] %s281_s11 }
  0x5f   : > { %p1868_p9 = pneg %p2188_p11  ;;  %s1871_s21 = scalar_lea.hbm %s2331_s0, 7168 }
  0x60   : > { %p1872_p1 = scmp.lt.u32.totalorder %s2186_s23, %s2331_s0  ;;  %p1873_p2 = scmp.lt.u32.totalorder %s1871_s21, %s1866_s8 }
  0x61   : > { %p1869_p12 = pnand %p1868_p9, %p1867_p7  ;;  %p1875_p8 = scmp.lt.u32.totalorder %s1866_s8, %s2186_s23 }
  0x62   : > { %p1874_p4 = por %p1873_p2, %p1872_p1 }
  0x63   : > { %p1870_p0 = pneg %p1869_p12 }
  0x64   : > { %p1876_p13 = por %p1875_p8, %p1874_p4 }
  0x66   : > { %p1877_p6 = pnand %p1876_p13, %p1870_p0 }
  0x68   : > { %1880 = shalt.err (!%p1877_p6)
}
  0x69   : > { %s1881_s20 = scalar_lea.vmem %s2192_s11, 3584  ;;  %s1977_s16 = smov [#allocation2]  }
  0x6a   : > { %p1882_p10 = scmp.ne.s32.totalorder %s2192_s11, %s1881_s20  ;;  %s1886_s10 = sshll.u32 %s1977_s16, 4  ;;  %s1887_s10 = int_to_ptr.vmem [resolvable:$false] %s1886_s10 }
  0x6b   : > { %s1888_s12 = scalar_lea.vmem %s1887_s10, 7168  ;;  %p1889_p12 = scmp.lt.s32.totalorder %s2192_s11, %s1887_s10 }
  0x6c   : > { %p1884_p3 = pnand %p1882_p10, %p1868_p9  ;;  %p1890_p1 = scmp.lt.s32.totalorder %s1888_s12, %s1881_s20 }
  0x6e   : > { %p1885_p7 = pneg %p1884_p3  ;;  %p1891_p2 = por %p1890_p1, %p1889_p12 }
  0x70   : > { %p1892_p4 = pnand %p1891_p2, %p1885_p7 }
  0x72   : > { %1895 = shalt.err (!%p1892_p4)
}
  0x73   : > { %s1978_s8 = smov 896   ;;  %s1979_s17 = smov 56  }
  0x74   : > { %1728 = dma.hbm_to_vmem [thread:$0]  (!%p2188_p11), %s2186_s23, 3584, %s2192_s11, %s2194_s14, %s1978_s8, %s1978_s8, %s1979_s17  }
  0x75   : > { %p2352_p9 = scmp.ne.s32.totalorder %s2346_s9, 0 }
  0x76   : > { %s2225_s21 = sand.u32 (!%p2352_p9), 1, %s1962_s25   ;;  %p2353_p0 = scmp.ne.s32.totalorder (!%p2352_p9), %s2343_s30, 0 }
  0x77   : > { %293 = sbr.rel (%p2352_p9) target bundleno = 882 (0x372), region = 48  ;;  %s296_s15 = scalar_lea.sflag (!%p2352_p9), [#allocation3], %s2225_s21 }
  0x78   : > { %s1698_s13 = smul.u32 (!%p2352_p9), 224, %s2225_s21 }
  0x7a   : > { %s2229_s20 = scalar_lea.vmem (!%p2352_p9), [#allocation2], %s1698_s13 }
  0x7e   : > { %1941 = dma.done.wait (%p2353_p0), %s296_s15, 3584  }
  0x7f   : > { %1943 = vsyncadd (%p2353_p0), %s296_s15, 4294963712  ;;  %p2354_p11 = scmp.eq.s32.totalorder %s2044_s28, 0 }
  0x81   : > { %1945 = dma.done.wait (%p2354_p11), [#allocation6], 16384   ;;  %p2355_p8 = pmov %p2354_p11 }
  0x83   : > { %1947 = vsyncadd (%p2355_p8), [#allocation6], 4294950912  ;;  %p2356_p13 = pmov %p2355_p8 }
  0x84   : > { %p2357_p6 = pmov %p2355_p8 }
  0x85   : > { %1949 = dma.done.wait (%p2356_p13), [#allocation9], 2048  }
  0x86   : > { %1951 = vsyncadd (%p2357_p6), [#allocation9], 4294965248  ;;  %v388_v0 = vld [vmem:[#allocation5 + $0x80] sm:$0xff]  ;;  %v389_v1 = vld [vmem:[#allocation5 + $0x88] sm:$0xff]  ;;  %s1188_s11 = sshll.u32 %s2225_s21, 5  ;;  %s1197_s8 = sshll.u32 %s2044_s28, 9 }
  0x87   : > { %v372_v2 = vld [vmem:[#allocation5] sm:$0xff]  ;;  %v1504_v3 = vpack.c.bf16 %v389_v1, %v388_v0  ;;  %v373_v4 = vld [vmem:[#allocation5 + $0x8] sm:$0xff]  ;;  %v390_v11 = vld [vmem:[#allocation5 + $0x90] sm:$0xff]  ;;  %s341_s10 = scalar_lea.vmem [#allocation10], %s1188_s11  ;;  %s2287_s15 = scalar_lea.hbm %s2338_s7, %s1197_s8 }
  0x88   : > { %v420_v5 = vld [vmem:[#allocation5 + $0x180] sm:$0xff]  ;;  %v421_v6 = vld [vmem:[#allocation5 + $0x188] sm:$0xff]  ;;  %v1506_v7 = vpack.c.bf16 %v373_v4, %v372_v2  ;;  %v391_v13 = vld [vmem:[#allocation5 + $0x98] sm:$0xff]  ;;  %s1073_s12 = sshll.u32 %s341_s10, 4  ;;  %s1980_s28 = smov [#allocation10]   ;;  %s2282_s12 = int_to_ptr.vmem [resolvable:$true] %s1073_s12 }
  0x89   : > { %v1536_v8 = vpack.c.bf16 %v421_v6, %v420_v5  ;;  %v404_v9 = vld [vmem:[#allocation5 + $0x100] sm:$0xff]  ;;  %v405_v10 = vld [vmem:[#allocation5 + $0x108] sm:$0xff]  ;;  %1505 = vmatprep.subr.bf16.mxu0 %v1504_v3  ;;  %v374_v14 = vld [vmem:[#allocation5 + $0x10] sm:$0xff]  ;;  %v1508_v16 = vpack.c.bf16 %v391_v13, %v390_v11  ;;  %s1896_s30 = scalar_lea.vmem %s2282_s12, 512  ;;  %s1900_s9 = sshll.u32 %s1980_s28, 4  ;;  %s1901_s9 = int_to_ptr.vmem [resolvable:$false] %s1900_s9 }
  0x8a   : > { %v1538_v12 = vpack.c.bf16 %v405_v10, %v404_v9  ;;  %v375_v15 = vld [vmem:[#allocation5 + $0x18] sm:$0xff]  ;;  %1507 = vmatpush3.bf16.msra.mxu0 %v1506_v7  ;;  %v422_v18 = vld [vmem:[#allocation5 + $0x190] sm:$0xff]  ;;  %v392_v23 = vld [vmem:[#allocation5 + $0xa0] sm:$0xff]  ;;  %p1897_p10 = scmp.ne.s32.totalorder %s2282_s12, %s1896_s30  ;;  %s1902_s23 = scalar_lea.vmem %s1901_s9, 1024 }
  0x8b   : > { %1537 = vmatprep.subr.bf16.mxu1 %v1536_v8  ;;  %v1510_v17 = vpack.c.bf16 %v375_v15, %v374_v14  ;;  %v423_v19 = vld [vmem:[#allocation5 + $0x198] sm:$0xff]  ;;  %v406_v20 = vld [vmem:[#allocation5 + $0x110] sm:$0xff]  ;;  %v393_v24 = vld [vmem:[#allocation5 + $0xa8] sm:$0xff]  ;;  %1509 = vmatprep.subr.bf16.mxu0 %v1508_v16  ;;  %p1903_p12 = scmp.lt.s32.totalorder %s2282_s12, %s1901_s9  ;;  %p1904_p1 = scmp.lt.s32.totalorder %s1902_s23, %s1896_s30 }
  0x8c   : > { %1539 = vmatpush3.bf16.msra.mxu1 %v1538_v12  ;;  %v1540_v21 = vpack.c.bf16 %v423_v19, %v422_v18  ;;  %v407_v22 = vld [vmem:[#allocation5 + $0x118] sm:$0xff]  ;;  %v1512_v26 = vpack.c.bf16 %v393_v24, %v392_v23  ;;  %v376_v27 = vld [vmem:[#allocation5 + $0x20] sm:$0xff]  ;;  %v377_v28 = vld [vmem:[#allocation5 + $0x28] sm:$0xff]  ;;  %p1898_p3 = pnand %p1897_p10, %p2177_p5 }
  0x8d   : > { %v1542_v25 = vpack.c.bf16 %v407_v22, %v406_v20  ;;  %v424_v29 = vld [vmem:[#allocation5 + $0x1a0] sm:$0xff]  ;;  %v425_v30 = vld [vmem:[#allocation5 + $0x1a8] sm:$0xff]  ;;  %v1514_v33 = vpack.c.bf16 %v377_v28, %v376_v27  ;;  %v394_v35 = vld [vmem:[#allocation5 + $0xb0] sm:$0xff]  ;;  %p1905_p2 = por %p1904_p1, %p1903_p12 }
  0x8e   : > { %1541 = vmatprep.subr.bf16.mxu1 %v1540_v21  ;;  %v408_v31 = vld [vmem:[#allocation5 + $0x120] sm:$0xff]  ;;  %v409_v32 = vld [vmem:[#allocation5 + $0x128] sm:$0xff]  ;;  %1511 = vmatpush3.bf16.msra.mxu0 %v1510_v17  ;;  %v1544_v34 = vpack.c.bf16 %v425_v30, %v424_v29  ;;  %v395_v36 = vld [vmem:[#allocation5 + $0xb8] sm:$0xff]  ;;  %p1899_p7 = pneg %p1898_p3 }
  0x8f   : > { %v378_v37 = vld [vmem:[#allocation5 + $0x30] sm:$0xff]  ;;  %1513 = vmatprep.subr.bf16.mxu0 %v1512_v26  ;;  %v1546_v38 = vpack.c.bf16 %v409_v32, %v408_v31  ;;  %v1516_v39 = vpack.c.bf16 %v395_v36, %v394_v35  ;;  %v379_v40 = vld [vmem:[#allocation5 + $0x38] sm:$0xff]  ;;  %v396_v46 = vld [vmem:[#allocation5 + $0xc0] sm:$0xff] }
  0x90   : > { %1543 = vmatpush3.bf16.msra.mxu1 %v1542_v25  ;;  %v426_v41 = vld [vmem:[#allocation5 + $0x1b0] sm:$0xff]  ;;  %v427_v42 = vld [vmem:[#allocation5 + $0x1b8] sm:$0xff]  ;;  %v397_v47 = vld [vmem:[#allocation5 + $0xc8] sm:$0xff]  ;;  %v1518_v48 = vpack.c.bf16 %v379_v40, %v378_v37  ;;  %p1906_p4 = pnand %p1905_p2, %p1899_p7 }
  0x91   : > { %1545 = vmatprep.subr.bf16.mxu1 %v1544_v34  ;;  %v1548_v43 = vpack.c.bf16 %v427_v42, %v426_v41  ;;  %v410_v44 = vld [vmem:[#allocation5 + $0x130] sm:$0xff]  ;;  %v411_v45 = vld [vmem:[#allocation5 + $0x138] sm:$0xff]  ;;  %v428_v49 = vld [vmem:[#allocation5 + $0x1c0] sm:$0xff]  ;;  %v1520_v52 = vpack.c.bf16 %v397_v47, %v396_v46 }
  0x92   : > { %1515 = vmatpush3.bf16.msra.mxu0 %v1514_v33  ;;  %v429_v50 = vld [vmem:[#allocation5 + $0x1c8] sm:$0xff]  ;;  %v1550_v51 = vpack.c.bf16 %v411_v45, %v410_v44  ;;  %v380_v53 = vld [vmem:[#allocation5 + $0x40] sm:$0xff]  ;;  %v398_v58 = vld [vmem:[#allocation5 + $0xd0] sm:$0xff] }
  0x93   : > { %1517 = vmatprep.subr.bf16.mxu0 %v1516_v39  ;;  %v381_v54 = vld [vmem:[#allocation5 + $0x48] sm:$0xff]  ;;  %v412_v55 = vld [vmem:[#allocation5 + $0x140] sm:$0xff]  ;;  %v1552_v56 = vpack.c.bf16 %v429_v50, %v428_v49  ;;  %v399_v59 = vld [vmem:[#allocation5 + $0xd8] sm:$0xff] }
  0x94   : > { %1547 = vmatpush3.bf16.msra.mxu1 %v1546_v38  ;;  %v413_v57 = vld [vmem:[#allocation5 + $0x148] sm:$0xff]  ;;  %v430_v60 = vld [vmem:[#allocation5 + $0x1d0] sm:$0xff]  ;;  %v431_v61 = vld [vmem:[#allocation5 + $0x1d8] sm:$0xff]  ;;  %v1522_v62 = vpack.c.bf16 %v381_v54, %v380_v53  ;;  %v1524_v0 = vpack.c.bf16 %v399_v59, %v398_v58 }
  0x95   : > { %1549 = vmatprep.subr.bf16.mxu1 %v1548_v43  ;;  %v1554_v63 = vpack.c.bf16 %v413_v57, %v412_v55  ;;  %v382_v1 = vld [vmem:[#allocation5 + $0x50] sm:$0xff]  ;;  %v383_v2 = vld [vmem:[#allocation5 + $0x58] sm:$0xff]  ;;  %v1556_v4 = vpack.c.bf16 %v431_v61, %v430_v60  ;;  %v400_v6 = vld [vmem:[#allocation5 + $0xe0] sm:$0xff] }
  0x96   : > { %1519 = vmatpush3.bf16.msra.mxu0 %v1518_v48  ;;  %v414_v3 = vld [vmem:[#allocation5 + $0x150] sm:$0xff]  ;;  %v415_v5 = vld [vmem:[#allocation5 + $0x158] sm:$0xff]  ;;  %v401_v7 = vld [vmem:[#allocation5 + $0xe8] sm:$0xff]  ;;  %v1526_v10 = vpack.c.bf16 %v383_v2, %v382_v1 }
  0x97   : > { %1521 = vmatprep.subr.bf16.mxu0 %v1520_v52  ;;  %v432_v8 = vld [vmem:[#allocation5 + $0x1e0] sm:$0xff]  ;;  %v433_v9 = vld [vmem:[#allocation5 + $0x1e8] sm:$0xff]  ;;  %v1558_v13 = vpack.c.bf16 %v415_v5, %v414_v3  ;;  %v1528_v14 = vpack.c.bf16 %v401_v7, %v400_v6  ;;  %v402_v19 = vld [vmem:[#allocation5 + $0xf0] sm:$0xff] }
  0x98   : > { %1551 = vmatpush3.bf16.msra.mxu1 %v1550_v51  ;;  %v384_v11 = vld [vmem:[#allocation5 + $0x60] sm:$0xff]  ;;  %v345_v12 = vld [vmem:[%s2229_s20 + $0x8] sm:$0xff]  ;;  %v1560_v18 = vpack.c.bf16 %v433_v9, %v432_v8  ;;  %v403_v20 = vld [vmem:[#allocation5 + $0xf8] sm:$0xff] }
  0x99   : > { %1553 = vmatprep.subr.bf16.mxu1 %v1552_v56  ;;  %v385_v15 = vld [vmem:[#allocation5 + $0x68] sm:$0xff]  ;;  %v416_v16 = vld [vmem:[#allocation5 + $0x160] sm:$0xff]  ;;  %555 = vmatprep.mubr.f32.mxu0 %v345_v12  ;;  %v347_v21 = vld [vmem:[%s2229_s20 + $0x18] sm:$0xff]  ;;  %v1532_v26 = vpack.c.bf16 %v403_v20, %v402_v19 }
  0x9a   : > { %1523 = vmatpush3.bf16.msra.mxu0 %v1522_v62  ;;  %v417_v17 = vld [vmem:[#allocation5 + $0x168] sm:$0xff]  ;;  %v434_v22 = vld [vmem:[#allocation5 + $0x1f0] sm:$0xff]  ;;  %v435_v23 = vld [vmem:[#allocation5 + $0x1f8] sm:$0xff]  ;;  %640 = vmatprep.mubr.f32.mxu1 %v347_v21  ;;  %v1530_v24 = vpack.c.bf16 %v385_v15, %v384_v11 }
  0x9b   : > { %1525 = vmatprep.subr.bf16.mxu0 %v1524_v0  ;;  %v1562_v25 = vpack.c.bf16 %v417_v17, %v416_v16  ;;  %v386_v27 = vld [vmem:[#allocation5 + $0x70] sm:$0xff]  ;;  %v387_v28 = vld [vmem:[#allocation5 + $0x78] sm:$0xff]  ;;  %v1564_v30 = vpack.c.bf16 %v435_v23, %v434_v22  ;;  %v452_v32 = vld [vmem:[#allocation5 + $0x280] sm:$0xff] }
  0x9c   : > { %1555 = vmatpush3.bf16.msra.mxu1 %v1554_v63  ;;  %v418_v29 = vld [vmem:[#allocation5 + $0x170] sm:$0xff]  ;;  %v419_v31 = vld [vmem:[#allocation5 + $0x178] sm:$0xff]  ;;  %v453_v33 = vld [vmem:[#allocation5 + $0x288] sm:$0xff]  ;;  %v1534_v36 = vpack.c.bf16 %v387_v28, %v386_v27 }
  0x9d   : > { %1557 = vmatprep.subr.bf16.mxu1 %v1556_v4  ;;  %v468_v34 = vld [vmem:[#allocation5 + $0x300] sm:$0xff]  ;;  %v469_v35 = vld [vmem:[#allocation5 + $0x308] sm:$0xff]  ;;  %v1566_v37 = vpack.c.bf16 %v419_v31, %v418_v29  ;;  %v1568_v38 = vpack.c.bf16 %v453_v33, %v452_v32  ;;  %v454_v41 = vld [vmem:[#allocation5 + $0x290] sm:$0xff] }
  0x9e   : > { %1527 = vmatpush3.bf16.msra.mxu0 %v1526_v10  ;;  %v436_v39 = vld [vmem:[#allocation5 + $0x200] sm:$0xff]  ;;  %v437_v40 = vld [vmem:[#allocation5 + $0x208] sm:$0xff]  ;;  %v455_v42 = vld [vmem:[#allocation5 + $0x298] sm:$0xff]  ;;  %v1600_v43 = vpack.c.bf16 %v469_v35, %v468_v34 }
  0x9f   : > { %1529 = vmatprep.subr.bf16.mxu0 %v1528_v14  ;;  %v470_v44 = vld [vmem:[#allocation5 + $0x310] sm:$0xff]  ;;  %v471_v45 = vld [vmem:[#allocation5 + $0x318] sm:$0xff]  ;;  %v344_v46 = vld [vmem:[%s2229_s20] sm:$0xff]  ;;  %v1570_v47 = vpack.c.bf16 %v437_v40, %v436_v39  ;;  %v1572_v49 = vpack.c.bf16 %v455_v42, %v454_v41 }
  0xa0   : > { %1559 = vmatpush3.bf16.msra.mxu1 %v1558_v13  ;;  %v346_v48 = vld [vmem:[%s2229_s20 + $0x10] sm:$0xff]  ;;  %v439_v51 = vld [vmem:[#allocation5 + $0x218] sm:$0xff]  ;;  %v456_v52 = vld [vmem:[#allocation5 + $0x2a0] sm:$0xff]  ;;  %v1604_v54 = vpack.c.bf16 %v471_v45, %v470_v44 }
  0xa1   : > { %1561 = vmatprep.subr.bf16.mxu1 %v1560_v18  ;;  %v438_v50 = vld [vmem:[#allocation5 + $0x210] sm:$0xff]  ;;  %v457_v53 = vld [vmem:[#allocation5 + $0x2a8] sm:$0xff]  ;;  %v472_v55 = vld [vmem:[#allocation5 + $0x320] sm:$0xff] }
  0xa2   : > { %1531 = vmatpush3.bf16.msra.mxu0 %v1530_v24  ;;  %v473_v56 = vld [vmem:[#allocation5 + $0x328] sm:$0xff]  ;;  %v352_v57 = vld [vmem:[%s2229_s20 + $0x40] sm:$0xff]  ;;  %v1574_v58 = vpack.c.bf16 %v439_v51, %v438_v50  ;;  %v351_v59 = vld [vmem:[%s2229_s20 + $0x38] sm:$0xff]  ;;  %v1576_v61 = vpack.c.bf16 %v457_v53, %v456_v52 }
  0xa3   : > { %1533 = vmatprep.subr.bf16.mxu0 %v1532_v26  ;;  %v354_v60 = vld [vmem:[%s2229_s20 + $0x50] sm:$0xff]  ;;  %v440_v62 = vld [vmem:[#allocation5 + $0x220] sm:$0xff]  ;;  %v441_v63 = vld [vmem:[#allocation5 + $0x228] sm:$0xff]  ;;  %v1608_v3 = vpack.c.bf16 %v473_v56, %v472_v55 }
  0xa4   : > { %1563 = vmatpush3.bf16.msra.mxu1 %v1562_v25  ;;  %v353_v0 = vld [vmem:[%s2229_s20 + $0x48] sm:$0xff]  ;;  %v458_v1 = vld [vmem:[#allocation5 + $0x2b0] sm:$0xff]  ;;  %v459_v2 = vld [vmem:[#allocation5 + $0x2b8] sm:$0xff]  ;;  %v1578_v7 = vpack.c.bf16 %v441_v63, %v440_v62 }
  0xa5   : > { %1565 = vmatprep.subr.bf16.mxu1 %v1564_v30  ;;  %v474_v4 = vld [vmem:[#allocation5 + $0x330] sm:$0xff]  ;;  %v475_v5 = vld [vmem:[#allocation5 + $0x338] sm:$0xff]  ;;  %v361_v9 = vld [vmem:[%s2229_s20 + $0x88] sm:$0xff]  ;;  %v1580_v10 = vpack.c.bf16 %v459_v2, %v458_v1 }
  0xa6   : > { %1535 = vmatpush3.bf16.msra.mxu0 %v1534_v36  ;;  %v359_v6 = vld [vmem:[%s2229_s20 + $0x78] sm:$0xff]  ;;  %v358_v8 = vld [vmem:[%s2229_s20 + $0x70] sm:$0xff]  ;;  %v360_v13 = vld [vmem:[%s2229_s20 + $0x80] sm:$0xff]  ;;  %v1612_v16 = vpack.c.bf16 %v475_v5, %v474_v4 }
  0xa7   : > { %1569 = vmatprep.subr.bf16.mxu0 %v1568_v38  ;;  %v442_v11 = vld [vmem:[#allocation5 + $0x230] sm:$0xff]  ;;  %v443_v12 = vld [vmem:[#allocation5 + $0x238] sm:$0xff]  ;;  %v460_v14 = vld [vmem:[#allocation5 + $0x2c0] sm:$0xff] }
  0xa8   : > { %1567 = vmatpush3.bf16.msra.mxu1 %v1566_v37  ;;  %v461_v15 = vld [vmem:[#allocation5 + $0x2c8] sm:$0xff]  ;;  %v476_v17 = vld [vmem:[#allocation5 + $0x340] sm:$0xff]  ;;  %v366_v19 = vld [vmem:[%s2229_s20 + $0xb0] sm:$0xff]  ;;  %v1582_v20 = vpack.c.bf16 %v443_v12, %v442_v11 }
  0xa9   : > { %1601 = vmatprep.subr.bf16.mxu1 %v1600_v43  ;;  %556 = vmatmul.mubr.f32.vlgmr.msra.gmra.mrb[0].mxu0 %v344_v46  ;;  %v477_v18 = vld [vmem:[#allocation5 + $0x348] sm:$0xff]  ;;  %v368_v22 = vld [vmem:[%s2229_s20 + $0xc0] sm:$0xff]  ;;  %v1584_v23 = vpack.c.bf16 %v461_v15, %v460_v14  ;;  %v367_v26 = vld [vmem:[%s2229_s20 + $0xb8] sm:$0xff] }
  0xaa   : > { %1571 = vmatpush3.bf16.msra.mxu0 %v1570_v47  ;;  %560 = vmatprep.mubr.f32.mxu0 %v352_v57  ;;  %v365_v21 = vld [vmem:[%s2229_s20 + $0xa8] sm:$0xff]  ;;  %v444_v24 = vld [vmem:[#allocation5 + $0x240] sm:$0xff]  ;;  %v462_v27 = vld [vmem:[#allocation5 + $0x2d0] sm:$0xff]  ;;  %v1616_v29 = vpack.c.bf16 %v477_v18, %v476_v17 }
  0xab   : > { %641 = vmatmul.mubr.f32.vlgmr.msra.gmra.mrb[0].mxu1 %v346_v48  ;;  %1573 = vmatprep.subr.bf16.mxu0 %v1572_v49  ;;  %v445_v25 = vld [vmem:[#allocation5 + $0x248] sm:$0xff]  ;;  %v463_v28 = vld [vmem:[#allocation5 + $0x2d8] sm:$0xff]  ;;  %v478_v30 = vld [vmem:[#allocation5 + $0x350] sm:$0xff] }
  0xac   : > { %1603 = vmatpush3.bf16.msra.mxu1 %v1600_v43  ;;  %645 = vmatprep.mubr.f32.mxu1 %v354_v60  ;;  %v479_v31 = vld [vmem:[#allocation5 + $0x358] sm:$0xff]  ;;  %v349_v32 = vld [vmem:[%s2229_s20 + $0x28] sm:$0xff]  ;;  %v1586_v33 = vpack.c.bf16 %v445_v25, %v444_v24  ;;  %v350_v34 = vld [vmem:[%s2229_s20 + $0x30] sm:$0xff]  ;;  %v1588_v35 = vpack.c.bf16 %v463_v28, %v462_v27 }
  0xad   : > { %1605 = vmatprep.subr.bf16.mxu1 %v1604_v54  ;;  %561 = vmatmul.mubr.f32.gmra.mrb[2].mxu0 %v351_v59  ;;  %v446_v36 = vld [vmem:[#allocation5 + $0x250] sm:$0xff]  ;;  %v447_v37 = vld [vmem:[#allocation5 + $0x258] sm:$0xff]  ;;  %v464_v38 = vld [vmem:[#allocation5 + $0x2e0] sm:$0xff]  ;;  %v1620_v40 = vpack.c.bf16 %v479_v31, %v478_v30 }
  0xae   : > { %1575 = vmatpush3.bf16.msra.mxu0 %v1574_v58  ;;  %565 = vmatprep.mubr.f32.mxu0 %v359_v6  ;;  %v465_v39 = vld [vmem:[#allocation5 + $0x2e8] sm:$0xff]  ;;  %v480_v41 = vld [vmem:[#allocation5 + $0x360] sm:$0xff]  ;;  %v1590_v43 = vpack.c.bf16 %v447_v37, %v446_v36  ;;  %v466_v47 = vld [vmem:[#allocation5 + $0x2f0] sm:$0xff] }
  0xaf   : > { %646 = vmatmul.mubr.f32.gmra.mrb[2].mxu1 %v353_v0  ;;  %1577 = vmatprep.subr.bf16.mxu0 %v1576_v61  ;;  %v481_v42 = vld [vmem:[#allocation5 + $0x368] sm:$0xff]  ;;  %v1592_v44 = vpack.c.bf16 %v465_v39, %v464_v38  ;;  %v448_v45 = vld [vmem:[#allocation5 + $0x260] sm:$0xff]  ;;  %v467_v48 = vld [vmem:[#allocation5 + $0x2f8] sm:$0xff] }
  0xb0   : > { %1607 = vmatpush3.bf16.msra.mxu1 %v1604_v54  ;;  %650 = vmatprep.mubr.f32.mxu1 %v361_v9  ;;  %v449_v46 = vld [vmem:[#allocation5 + $0x268] sm:$0xff]  ;;  %v1624_v49 = vpack.c.bf16 %v481_v42, %v480_v41  ;;  %v482_v50 = vld [vmem:[#allocation5 + $0x370] sm:$0xff]  ;;  %v483_v51 = vld [vmem:[#allocation5 + $0x378] sm:$0xff]  ;;  %v1596_v53 = vpack.c.bf16 %v467_v48, %v466_v47 }
  0xb1   : > { %1609 = vmatprep.subr.bf16.mxu1 %v1608_v3  ;;  %566 = vmatmul.mubr.f32.gmra.mrb[4].mxu0 %v358_v8  ;;  %v1594_v52 = vpack.c.bf16 %v449_v46, %v448_v45  ;;  %v450_v54 = vld [vmem:[#allocation5 + $0x270] sm:$0xff]  ;;  %v451_v55 = vld [vmem:[#allocation5 + $0x278] sm:$0xff]  ;;  %v1628_v56 = vpack.c.bf16 %v483_v51, %v482_v50  ;;  %v348_v58 = vld [vmem:[%s2229_s20 + $0x20] sm:$0xff] }
  0xb2   : > { %1579 = vmatpush3.bf16.msra.mxu0 %v1578_v7  ;;  %570 = vmatprep.mubr.f32.mxu0 %v366_v19  ;;  %v1598_v57 = vpack.c.bf16 %v451_v55, %v450_v54  ;;  %v356_v59 = vld [vmem:[%s2229_s20 + $0x60] sm:$0xff]  ;;  %v357_v60 = vld [vmem:[%s2229_s20 + $0x68] sm:$0xff]  ;;  %v355_v62 = vld [vmem:[%s2229_s20 + $0x58] sm:$0xff] }
  0xb3   : > { %651 = vmatmul.mubr.f32.gmra.mrb[4].mxu1 %v360_v13  ;;  %1581 = vmatprep.subr.bf16.mxu0 %v1580_v10  ;;  %v364_v61 = vld [vmem:[%s2229_s20 + $0xa0] sm:$0xff]  ;;  %v363_v63 = vld [vmem:[%s2229_s20 + $0x98] sm:$0xff]  ;;  %v362_v1 = vld [vmem:[%s2229_s20 + $0x90] sm:$0xff] }
  0xb4   : > { %1611 = vmatpush3.bf16.msra.mxu1 %v1608_v3  ;;  %655 = vmatprep.mubr.f32.mxu1 %v368_v22  ;;  %v371_v0 = vld [vmem:[%s2229_s20 + $0xd8] sm:$0xff]  ;;  %v370_v2 = vld [vmem:[%s2229_s20 + $0xd0] sm:$0xff]  ;;  %v369_v3 = vld [vmem:[%s2229_s20 + $0xc8] sm:$0xff]  ;;  %s1060_s20 = scalar_lea.sflag [#allocation4], %s2225_s21 }
  0xb5   : > { %1613 = vmatprep.subr.bf16.mxu1 %v1612_v16  ;;  %571 = vmatmul.mubr.f32.gmra.mrb[6].mxu0 %v365_v21  ;;  %v835_v4 = vld [vmem:[#allocation7] sm:$0xff]  ;;  %v836_v5 = vld [vmem:[#allocation7 + $0x8] sm:$0xff]  ;;  %v837_v6 = vld [vmem:[#allocation7 + $0x10] sm:$0xff] }
  0xb6   : > { %1583 = vmatpush3.bf16.msra.mxu0 %v1582_v20  ;;  %725 = vmatprep.mubr.f32.mxu0 %v349_v32  ;;  %v1632_v7 = vpack.c.bf16 %v836_v5, %v835_v4  ;;  %v838_v8 = vld [vmem:[#allocation7 + $0x18] sm:$0xff]  ;;  %v839_v10 = vld [vmem:[#allocation7 + $0x20] sm:$0xff]  ;;  %v840_v11 = vld [vmem:[#allocation7 + $0x28] sm:$0xff] }
  0xb7   : > { %656 = vmatmul.mubr.f32.gmra.mrb[6].mxu1 %v367_v26  ;;  %1585 = vmatprep.subr.bf16.mxu0 %v1584_v23  ;;  %v1636_v9 = vpack.c.bf16 %v838_v8, %v837_v6  ;;  %v1640_v12 = vpack.c.bf16 %v840_v11, %v839_v10  ;;  %v841_v13 = vld [vmem:[#allocation7 + $0x30] sm:$0xff]  ;;  %v842_v14 = vld [vmem:[#allocation7 + $0x38] sm:$0xff]  ;;  %v844_v17 = vld [vmem:[#allocation7 + $0x48] sm:$0xff] }
  0xb8   : > { %1615 = vmatpush3.bf16.msra.mxu1 %v1612_v16  ;;  %1422 = vmatprep.mubr.f32.mxu1 %v350_v34  ;;  %v1644_v15 = vpack.c.bf16 %v842_v14, %v841_v13  ;;  %v843_v16 = vld [vmem:[#allocation7 + $0x40] sm:$0xff]  ;;  %v845_v19 = vld [vmem:[#allocation7 + $0x50] sm:$0xff]  ;;  %v846_v20 = vld [vmem:[#allocation7 + $0x58] sm:$0xff] }
  0xb9   : > { %1617 = vmatprep.subr.bf16.mxu1 %v1616_v29  ;;  %v1648_v18 = vpack.c.bf16 %v844_v17, %v843_v16  ;;  %v1652_v21 = vpack.c.bf16 %v846_v20, %v845_v19  ;;  %v847_v22 = vld [vmem:[#allocation7 + $0x60] sm:$0xff]  ;;  %v848_v23 = vld [vmem:[#allocation7 + $0x68] sm:$0xff]  ;;  %v849_v25 = vld [vmem:[#allocation7 + $0x70] sm:$0xff] }
  0xba   : > { %1587 = vmatpush3.bf16.msra.mxu0 %v1586_v33  ;;  %v1656_v24 = vpack.c.bf16 %v848_v23, %v847_v22  ;;  %v850_v26 = vld [vmem:[#allocation7 + $0x78] sm:$0xff]  ;;  %v947_v28 = vld [vmem:[#allocation8] sm:$0xff]  ;;  %v949_v30 = vld [vmem:[#allocation8 + $0x10] sm:$0xff] }
  0xbb   : > { %1589 = vmatprep.subr.bf16.mxu0 %v1588_v35  ;;  %v1660_v27 = vpack.c.bf16 %v850_v26, %v849_v25  ;;  %v950_v32 = vld [vmem:[#allocation8 + $0x18] sm:$0xff]  ;;  %v951_v34 = vld [vmem:[#allocation8 + $0x20] sm:$0xff]  ;;  %v952_v35 = vld [vmem:[#allocation8 + $0x28] sm:$0xff] }
  0xbc   : > { %1619 = vmatpush3.bf16.msra.mxu1 %v1616_v29  ;;  %v948_v29 = vld [vmem:[#allocation8 + $0x8] sm:$0xff]  ;;  %v1668_v33 = vpack.c.bf16 %v950_v32, %v949_v30  ;;  %v1672_v36 = vpack.c.bf16 %v952_v35, %v951_v34  ;;  %v953_v37 = vld [vmem:[#allocation8 + $0x30] sm:$0xff]  ;;  %v954_v38 = vld [vmem:[#allocation8 + $0x38] sm:$0xff] }
  0xbd   : > { %1621 = vmatprep.subr.bf16.mxu1 %v1620_v40  ;;  %v1664_v31 = vpack.c.bf16 %v948_v29, %v947_v28  ;;  %v1676_v39 = vpack.c.bf16 %v954_v38, %v953_v37  ;;  %v956_v41 = vld [vmem:[#allocation8 + $0x48] sm:$0xff]  ;;  %v959_v46 = vld [vmem:[#allocation8 + $0x60] sm:$0xff] }
  0xbe   : > { %1591 = vmatpush3.bf16.msra.mxu0 %v1590_v43  ;;  %v957_v43 = vld [vmem:[#allocation8 + $0x50] sm:$0xff]  ;;  %v960_v47 = vld [vmem:[#allocation8 + $0x68] sm:$0xff]  ;;  %v1189_v50 = vld [vmem:[%s2333_s2] ss:$0 sm:$0xff] }
  0xbf   : > { %1593 = vmatprep.subr.bf16.mxu0 %v1592_v44  ;;  %v958_v44 = vld [vmem:[#allocation8 + $0x58] sm:$0xff]  ;;  %v1688_v48 = vpack.c.bf16 %v960_v47, %v959_v46  ;;  %v961_v46 = vld [vmem:[#allocation8 + $0x70] sm:$0xff] }
  0xc0   : > { %1623 = vmatpush3.bf16.msra.mxu1 %v1620_v40  ;;  %v955_v40 = vld [vmem:[#allocation8 + $0x40] sm:$0xff]  ;;  %v1684_v45 = vpack.c.bf16 %v958_v44, %v957_v43  ;;  %v962_v47 = vld [vmem:[#allocation8 + $0x78] sm:$0xff] }
  0xc1   : > { %1625 = vmatprep.subr.bf16.mxu1 %v1624_v49  ;;  %v1680_v42 = vpack.c.bf16 %v956_v41, %v955_v40 }
  0xc2   : > { %1595 = vmatpush3.bf16.msra.mxu0 %v1594_v52 }
  0xc3   : > { %1597 = vmatprep.subr.bf16.mxu0 %v1596_v53 }
  0xc4   : > { %1627 = vmatpush3.bf16.msra.mxu1 %v1624_v49 }
  0xc5   : > { %1629 = vmatprep.subr.bf16.mxu1 %v1628_v56 }
  0xc6   : > { %1599 = vmatpush3.bf16.msra.mxu0 %v1598_v57 }
  0xc7   : > { %1633 = vmatprep.subr.bf16.mxu0 %v1632_v7 }
  0xc8   : > { %1631 = vmatpush3.bf16.msra.mxu1 %v1628_v56 }
  0xc9   : > { %726 = vmatmul.mubr.f32.vlgmr.msra.gmra.mrb[8].mxu0 %v348_v58  ;;  %1665 = vmatprep.subr.bf16.mxu1 %v1664_v31 }
  0xca   : > { %730 = vmatprep.mubr.f32.mxu0 %v356_v59  ;;  %1635 = vmatpush3.bf16.msra.mxu0 %v1632_v7 }
  0xcb   : > { %1423 = vmatmul.mubr.f32.vlgmr.msra.gmra.mrb[8].mxu1 %v357_v60  ;;  %1637 = vmatprep.subr.bf16.mxu0 %v1636_v9 }
  0xcc   : > { %1425 = vmatprep.mubr.f32.mxu1 %v364_v61  ;;  %1667 = vmatpush3.bf16.msra.mxu1 %v1664_v31 }
  0xcd   : > { %731 = vmatmul.mubr.f32.gmra.mrb[10].mxu0 %v355_v62  ;;  %1669 = vmatprep.subr.bf16.mxu1 %v1668_v33 }
  0xce   : > { %735 = vmatprep.mubr.f32.mxu0 %v363_v63  ;;  %1639 = vmatpush3.bf16.msra.mxu0 %v1636_v9 }
  0xcf   : > { %1426 = vmatmul.mubr.f32.gmra.mrb[10].mxu1 %v371_v0  ;;  %1641 = vmatprep.subr.bf16.mxu0 %v1640_v12 }
  0xd0   : > { %1671 = vmatpush3.bf16.msra.mxu1 %v1668_v33 }
  0xd1   : > { %736 = vmatmul.mubr.f32.gmra.mrb[12].mxu0 %v362_v1  ;;  %1673 = vmatprep.subr.bf16.mxu1 %v1672_v36 }
  0xd2   : > { %740 = vmatprep.mubr.f32.mxu0 %v370_v2  ;;  %1643 = vmatpush3.bf16.msra.mxu0 %v1640_v12 }
  0xd3   : > { %1645 = vmatprep.subr.bf16.mxu0 %v1644_v15 }
  0xd4   : > { %1675 = vmatpush3.bf16.msra.mxu1 %v1672_v36 }
  0xd5   : > { %741 = vmatmul.mubr.f32.gmra.mrb[14].mxu0 %v369_v3  ;;  %1677 = vmatprep.subr.bf16.mxu1 %v1676_v39 }
  0xd6   : > { %1647 = vmatpush3.bf16.msra.mxu0 %v1644_v15 }
  0xd7   : > { %1649 = vmatprep.subr.bf16.mxu0 %v1648_v18 }
  0xd8   : > { %1679 = vmatpush3.bf16.msra.mxu1 %v1676_v39 }
  0xd9   : > { %1681 = vmatprep.subr.bf16.mxu1 %v1680_v42 }
  0xda   : > { %1651 = vmatpush3.bf16.msra.mxu0 %v1648_v18 }
  0xdb   : > { %1653 = vmatprep.subr.bf16.mxu0 %v1652_v21 }
  0xdc   : > { %1683 = vmatpush3.bf16.msra.mxu1 %v1680_v42 }
  0xdd   : > { %1685 = vmatprep.subr.bf16.mxu1 %v1684_v45 }
  0xde   : > { %1655 = vmatpush3.bf16.msra.mxu0 %v1652_v21 }
  0xdf   : > { %1657 = vmatprep.subr.bf16.mxu0 %v1656_v24 }
  0xe0   : > { %1687 = vmatpush3.bf16.msra.mxu1 %v1684_v45 }
  0xe1   : > { %1689 = vmatprep.subr.bf16.mxu1 %v1688_v48 }
  0xe2   : > { %1659 = vmatpush3.bf16.msra.mxu0 %v1656_v24 }
  0xe3   : > { %1661 = vmatprep.subr.bf16.mxu0 %v1660_v27 }
  0xe4   : > { %1691 = vmatpush3.bf16.msra.mxu1 %v1688_v48  ;;  %v1692_v48 = vpack.c.bf16 %v962_v47, %v961_v46 }
  0xe6   : > { %1663 = vmatpush3.bf16.msra.mxu0 %v1660_v27  ;;  %1693 = vmatprep.subr.bf16.mxu1 %v1692_v48 }
  0xe8   : > { %1695 = vmatpush3.bf16.msra.mxu1 %v1692_v48 }
 0x17c   : > { %v1230_v49 = vpop.f32.mrb[0].mxu0 }
 0x17d   : > { %v1231_v51 = vpop.f32.mrb[1].mxu0 }
 0x17e   : > { %v1274_v52 = vpop.f32.mrb[0].mxu1  ;;  %v1232_v53 = vadd.f32 %v1231_v51, %v1230_v49  ;;  %v1190_v49 = vld [vmem:[%s2335_s4] ss:$0 sm:$0xff] }
 0x17f   : > { %v1275_v54 = vpop.f32.mrb[1].mxu1 }
 0x180   : > { %v1276_v55 = vadd.f32 %v1275_v54, %v1274_v52  ;;  %v558_v56 = vadd.f32 %v1232_v53, %v1189_v50  ;;  %v1233_v57 = vpop.f32.mrb[2].mxu0 }
 0x181   : > { %v1234_v58 = vpop.f32.mrb[3].mxu0 }
 0x182   : > { %v1277_v59 = vpop.f32.mrb[2].mxu1  ;;  %v643_v60 = vadd.f32 %v1276_v55, %v558_v56  ;;  %v1235_v61 = vadd.f32 %v1234_v58, %v1233_v57 }
 0x183   : > { %v1278_v62 = vpop.f32.mrb[3].mxu1 }
 0x184   : > { %v1279_v63 = vadd.f32 %v1278_v62, %v1277_v59  ;;  %v563_v0 = vadd.f32 %v1235_v61, %v1189_v50  ;;  %v1236_v1 = vpop.f32.mrb[4].mxu0  ;;  %v1191_v62 = vld [vmem:[%s2337_s6] ss:$0 sm:$0xff] }
 0x185   : > { %v1237_v2 = vpop.f32.mrb[5].mxu0 }
 0x186   : > { %v1280_v3 = vpop.f32.mrb[4].mxu1  ;;  %v648_v4 = vadd.f32 %v1279_v63, %v563_v0  ;;  %v1238_v5 = vadd.f32 %v1237_v2, %v1236_v1 }
 0x187   : > { %v1281_v6 = vpop.f32.mrb[5].mxu1 }
 0x188   : > { %v1282_v7 = vadd.f32 %v1281_v6, %v1280_v3  ;;  %v568_v8 = vadd.f32 %v1238_v5, %v1189_v50  ;;  %v1239_v9 = vpop.f32.mrb[6].mxu0 }
 0x189   : > { %v1240_v10 = vpop.f32.mrb[7].mxu0 }
 0x18a   : > { %v1283_v11 = vpop.f32.mrb[6].mxu1  ;;  %v653_v12 = vadd.f32 %v1282_v7, %v568_v8  ;;  %v1241_v13 = vadd.f32 %v1240_v10, %v1239_v9 }
 0x18b   : > { %v1284_v14 = vpop.f32.mrb[7].mxu1 }
 0x18c   : > { %v1285_v15 = vadd.f32 %v1284_v14, %v1283_v11  ;;  %v573_v16 = vadd.f32 %v1241_v13, %v1189_v50 }
 0x18e   : > { %v658_v17 = vadd.f32 %v1285_v15, %v573_v16 }
 0x19c   : > { %v1318_v18 = vpop.f32.mrb[8].mxu0 }
 0x19d   : > { %v1319_v19 = vpop.f32.mrb[9].mxu0 }
 0x19e   : > { %v1424_v20 = vpop.f32.mrb[8].mxu1  ;;  %v1320_v21 = vadd.f32 %v1319_v19, %v1318_v18 }
 0x19f   : > { %v812_v22 = vpop.f32.mrb[9].mxu1 }
 0x1a0   : > { %v1321_v23 = vpop.f32.mrb[10].mxu0  ;;  %v728_v24 = vadd.f32 %v1320_v21, %v643_v60 }
 0x1a1   : > { %v1322_v25 = vpop.f32.mrb[11].mxu0 }
 0x1a2   : > { %v1427_v26 = vpop.f32.mrb[10].mxu1  ;;  %v1323_v27 = vadd.f32 %v1322_v25, %v1321_v23  ;;  %v813_v28 = vadd.f32 %v812_v22, %v728_v24 }
 0x1a3   : > { %v822_v29 = vpop.f32.mrb[11].mxu1 }
 0x1a4   : > { %v733_v30 = vadd.f32 %v1323_v27, %v648_v4  ;;  %v831_v31 = vmax.f32 %v813_v28, 0.0  ;;  %v1324_v32 = vpop.f32.mrb[12].mxu0 }
 0x1a5   : > { %v1325_v33 = vpop.f32.mrb[13].mxu0 }
 0x1a6   : > { %v818_v34 = vadd.f32 %v1424_v20, %v733_v30  ;;  %v1326_v35 = vadd.f32 %v1325_v33, %v1324_v32  ;;  %1460 = vmatprep.mubr.f32.mxu0 %v831_v31 }
 0x1a8   : > { %v832_v36 = vmax.f32 %v818_v34, 0.0  ;;  %v1327_v37 = vpop.f32.mrb[14].mxu0  ;;  %v738_v38 = vadd.f32 %v1326_v35, %v653_v12 }
 0x1a9   : > { %v1328_v39 = vpop.f32.mrb[15].mxu0 }
 0x1aa   : > { %v1329_v40 = vadd.f32 %v1328_v39, %v1327_v37  ;;  %v823_v41 = vadd.f32 %v822_v29, %v738_v38  ;;  %1461 = vmatmul.mubr.f32.vlgmr.msra.gmra.mrb[16].mxu0 %v832_v36 }
 0x1ac   : > { %v743_v42 = vadd.f32 %v1329_v40, %v658_v17  ;;  %v833_v43 = vmax.f32 %v823_v41, 0.0 }
 0x1ae   : > { %1463 = vmatprep.mubr.f32.mxu0 %v833_v43  ;;  %v828_v44 = vadd.f32 %v1427_v26, %v743_v42 }
 0x1b0   : > { %v834_v45 = vmax.f32 %v828_v44, 0.0 }
 0x1b2   : > { %1464 = vmatmul.mubr.f32.gmra.mrb[18].mxu0 %v834_v45 }
 0x27d   : > { %v1462_v50 = vpop.f32.mrb[16].mxu0 }
 0x27e   : > { %v930_v51 = vadd.f32 %v1462_v50, %v1190_v49  ;;  %v924_v52 = vpop.f32.mrb[17].mxu0 }
 0x27f   : > { %v925_v53 = vadd.f32 %v1190_v49, %v924_v52 }
 0x280   : > { %v944_v55 = vmax.f32 %v930_v51, 0.0 }
 0x281   : > { %v943_v54 = vmax.f32 %v925_v53, 0.0 }
 0x283   : > { %1498 = vmatprep.mubr.f32.mxu1 %v943_v54 }
 0x284   : > { %1499 = vmatmul.mubr.f32.vlgmr.msra.gmra.mrb[12].mxu1 %v944_v55 }
 0x285   : > { %v1465_v56 = vpop.f32.mrb[18].mxu0 }
 0x286   : > { %v940_v57 = vadd.f32 %v1465_v56, %v1190_v49  ;;  %v934_v58 = vpop.f32.mrb[19].mxu0 }
 0x287   : > { %v935_v59 = vadd.f32 %v1190_v49, %v934_v58 }
 0x288   : > { %v946_v61 = vmax.f32 %v940_v57, 0.0 }
 0x289   : > { %v945_v60 = vmax.f32 %v935_v59, 0.0 }
 0x28b   : > { %1501 = vmatprep.mubr.f32.mxu1 %v945_v60 }
 0x28c   : > { %1502 = vmatmul.mubr.f32.gmra.mrb[14].mxu1 %v946_v61 }
 0x357   : > { %v1500_v63 = vpop.f32.mrb[12].mxu1 }
 0x358   : > { %v1042_v0 = vadd.f32 %v1500_v63, %v1191_v62  ;;  %v1036_v1 = vpop.f32.mrb[13].mxu1 }
 0x359   : > { %v1037_v2 = vadd.f32 %v1191_v62, %v1036_v1 }
 0x35a   : > { %1056 = vst [vmem:[%s341_s10 + $0x8] sm:$0xff] %v1042_v0 }
 0x35b   : > { %1055 = vst [vmem:[%s341_s10] sm:$0xff] %v1037_v2 }
 0x35f   : > { %v1503_v3 = vpop.f32.mrb[14].mxu1 }
 0x360   : > { %v1052_v4 = vadd.f32 %v1503_v3, %v1191_v62  ;;  %v1046_v5 = vpop.f32.mrb[15].mxu1 }
 0x361   : > { %v1047_v6 = vadd.f32 %v1191_v62, %v1046_v5 }
 0x362   : > { %1058 = vst [vmem:[%s341_s10 + $0x18] sm:$0xff] %v1052_v4 }
 0x363   : > { %1057 = vst [vmem:[%s341_s10 + $0x10] sm:$0xff] %v1047_v6 }
 0x364   : > { %1909 = shalt.err (!%p1906_p4)
}
 0x365   : > { %s1910_s29 = scalar_lea.hbm %s2287_s15, 512  ;;  %s1914_s16 = scalar_lea.hbm %s2338_s7, 1024 }
 0x366   : > { %p1911_p9 = scmp.ne.s32.totalorder %s2287_s15, %s1910_s29  ;;  %p1915_p8 = scmp.lt.u32.totalorder %s2287_s15, %s2338_s7 }
 0x367   : > { %p1916_p13 = scmp.lt.u32.totalorder %s1914_s16, %s1910_s29  ;;  %p1918_p10 = scmp.lt.u32.totalorder %s1910_s29, %s2287_s15 }
 0x368   : > { %p1912_p0 = pnand %p1911_p9, %p2177_p5 }
 0x369   : > { %p1917_p6 = por %p1916_p13, %p1915_p8 }
 0x36a   : > { %p1913_p11 = pneg %p1912_p0 }
 0x36b   : > { %p1919_p3 = por %p1918_p10, %p1917_p6 }
 0x36d   : > { %p1920_p7 = pnand %p1919_p3, %p1913_p11 }
 0x36f   : > { %1923 = shalt.err (!%p1920_p7)
}
 0x370   : > { %s1981_s17 = smov 128   ;;  %s1982_s13 = smov 8  }
 0x371   : > { %1713 = dma.vmem_to_hbm [thread:$0]  (%p2177_p5), %s2282_s12, 512, %s2287_s15, %s1060_s20, %s1981_s17, %s1981_s17, %s1982_s13  }
 0x372 PF: > { %s2358_s30 = sld [smem:[#allocation15_spill]]  ;;  %s1088_s28 = sand.u32 1, %s1958_s24  }
 0x373   : > { %p2360_p1 = scmp.ge.s32.totalorder %s1970_s27, 2  ;;  %s1089_s9 = scalar_lea.sflag [#allocation4], %s1088_s28 }
 0x378   : > { %p2359_p12 = scmp.ne.s32.totalorder %s2358_s30, 0 }
 0x37a   : > { %p1730_p2 = pnand %p2360_p1, %p2359_p12 }
 0x37c   : > { %1953 = dma.done.wait (!%p1730_p2), %s1089_s9, 512  }
 0x37d   : > { %1955 = vsyncadd (!%p1730_p2), %s1089_s9, 4294966784  ;;  %p22_p4 = scmp.ge.s32.totalorder %s2163_s22, 4   ;;  %s2361_s24 = smov %s1962_s25 }
 0x37e   : > { %s2362_s25 = smov %s1966_s26  ;;  %s2363_s26 = smov %s2173_s18 }
 0x37f   : > { %s2364_s27 = smov %s2163_s22  ;;  %24 = sbr.rel (!%p22_p4) target bundleno = 7 (0x7), region = 105 }
 0x386   :  { %1094 = vsyncpa [#allocation3], 1 }
 0x387   :  { %1096 = vsyncpa [#allocation3 + $0x1], 1 }
 0x388   :  { %1097 = vsyncpa [#allocation6], 1 }
 0x389   :  { %1098 = vsyncpa [#allocation9], 1 }
 0x38a   :  { %1099 = vsyncpa [#allocation4], 1 }
 0x38b   :  { %1101 = vsyncpa [#allocation4 + $0x1], 1 }

// kernel: tpu_custom_call.1
= control target key start
LH: loop header
LB: loop body
LE: loop exit
PB: predicated region body
PF: predicated region fallthrough
CT: control target
= control target key end

     0   :  { %12 = vsyncpa [#allocation3], 0  ;;  %s2331_s0 = inlined_call_operand.hbm [shape: f32[64,896], index: 0, kind: input, shape index: {}]   ;;  %s2332_s1 = inlined_call_operand.hbm [shape: f32[896,128], index: 1, kind: input, shape index: {}]   ;;  %s2333_s2 = inlined_call_operand.vmem [shape: f32[1,128], index: 2, kind: input, shape index: {}]   ;;  %s2334_s3 = inlined_call_operand.hbm [shape: f32[128,128], index: 3, kind: input, shape index: {}]   ;;  %s2335_s4 = inlined_call_operand.vmem [shape: f32[1,128], index: 4, kind: input, shape index: {}]   ;;  %s2336_s5 = inlined_call_operand.hbm [shape: f32[128,128], index: 5, kind: input, shape index: {}]   ;;  %s2337_s6 = inlined_call_operand.vmem [shape: f32[1,128], index: 6, kind: input, shape index: {}]   ;;  %s2338_s7 = inlined_call_operand.hbm [shape: f32[64,128], index: 7, kind: output, shape index: {}]  }
   0x1   :  { %14 = vsyncpa [#allocation3 + $0x1], 0 }
   0x2   :  { %15 = vsyncpa [#allocation6], 0 }
   0x3   :  { %16 = vsyncpa [#allocation9], 0 }
   0x4   :  { %17 = vsyncpa [#allocation4], 0 }
   0x5   :  { %19 = vsyncpa [#allocation4 + $0x1], 0  ;;  %s2023_s24 = smov 0   ;;  %s2025_s25 = smov 0  }
   0x6   :  { %s2027_s26 = smov 0   ;;  %s2029_s27 = smov 0  }
   0x7 LB: > { %s2044_s28 = sadd.s32 4294967295, %s1970_s27   ;;  %s1175_s29 = sadd.s32 4294967294, %s1970_s27   ;;  %s1970_s27 = sphi %s2029_s27, %s2364_s27   ;;  %s1966_s26 = sphi %s2027_s26, %s2363_s26   ;;  %s1962_s25 = sphi %s2025_s25, %s2362_s25   ;;  %s1958_s24 = sphi %s2023_s24, %s2361_s24  }
   0x8   : > { %p45_p0 = scmp.ne.s32.totalorder %s1962_s25, %s1958_s24  ;;  %p2339_p1 = scmp.eq.s32.totalorder %s2044_s28, 0 }
   0x9   : > { %p201_p3 = scmp.eq.s32.totalorder %s1175_s29, 1  ;;  %p1176_p5 = scmp.ge.s32.totalorder %s1970_s27, 1 }
   0xa   : > { %p2053_p4 = por %p2339_p1, %p45_p0  ;;  %p208_p7 = scmp.lt.s32.totalorder %s1970_s27, 3 }
   0xb   : > { %p2058_p6 = por %p201_p3, %p45_p0  ;;  %s1972_s10 = smov [#allocation5]  }
   0xc   : > { %s2343_s30 = scalar_select %p2053_p4, 1, 0 }
   0xd   : > { %s2344_s8 = scalar_select %p2058_p6, 1, 0 }
   0xe   : > { %p2063_p8 = pnand %p1176_p5, %p208_p7  ;;  %s220_s11 = sshll.u32 %s1972_s10, 4  ;;  %s2067_s11 = int_to_ptr.vmem [resolvable:$true] %s220_s11 }
   0xf   : > { %2345 = sst [smem:[#allocation15_spill]] %s2344_s8  ;;  %s1973_s13 = smov [#allocation7]  }
  0x10   : > { %s2346_s9 = scalar_select %p2063_p8, 1, 0 }
  0x11   : > { %p1715_p9 = pneg %p2063_p8  ;;  %s236_s14 = sshll.u32 %s1973_s13, 4  ;;  %s2078_s14 = int_to_ptr.vmem [resolvable:$true] %s236_s14 }
  0x12   : > { %s1974_s15 = smov [#allocation8]   ;;  %s1782_s19 = scalar_lea.hbm %s2332_s1, 14336 }
  0x13   : > { %p2074_p11 = pnand %p1715_p9, %p2339_p1  ;;  %s2080_s16 = sshll.u32 %s1974_s15, 4  ;;  %s253_s16 = int_to_ptr.vmem [resolvable:$true] %s2080_s16 }
  0x14   : > { %p1783_p12 = scmp.ne.s32.totalorder %s2332_s1, %s1782_s19  ;;  %p1789_p5 = scmp.lt.u32.totalorder %s1782_s19, %s2332_s1 }
  0x15   : > { %p2090_p13 = pneg %p2074_p11 }
  0x17   : > { %p1785_p0 = pnand %p2090_p13, %p1783_p12 }
  0x19   : > { %p1786_p3 = pneg %p1785_p0 }
  0x1b   : > { %p1791_p7 = pnand %p1789_p5, %p1786_p3 }
  0x1d   : > { %1794 = shalt.err (!%p1791_p7)
}
  0x1e   : > { %s1795_s10 = scalar_lea.vmem %s2067_s11, 14336  ;;  %p1803_p2 = scmp.lt.s32.totalorder %s2067_s11, %s2067_s11 }
  0x1f   : > { %p1796_p9 = scmp.ne.s32.totalorder %s2067_s11, %s1795_s10  ;;  %p1804_p6 = scmp.lt.s32.totalorder %s1795_s10, %s1795_s10 }
  0x21   : > { %p1798_p10 = pnand %p1796_p9, %p2090_p13  ;;  %p1805_p12 = por %p1804_p6, %p1803_p2 }
  0x23   : > { %p1799_p1 = pneg %p1798_p10 }
  0x25   : > { %p1806_p0 = pnand %p1805_p12, %p1799_p1 }
  0x27   : > { %1809 = shalt.err (!%p1806_p0)
}
  0x28   : > { %s1975_s13 = smov 128   ;;  %s1976_s15 = smov 8  }
  0x29   : > { %1718 = dma.hbm_to_vmem [thread:$0]  (!%p2074_p11), %s2332_s1, 14336, %s2067_s11, [#allocation6], %s1975_s13, %s1975_s13, %s1976_s15  }
  0x2a   : > { %s1810_s21 = scalar_lea.hbm %s2334_s3, 2048 }
  0x2b   : > { %p1811_p1 = scmp.ne.s32.totalorder %s2334_s3, %s1810_s21  ;;  %p1817_p10 = scmp.lt.u32.totalorder %s1810_s21, %s2334_s3 }
  0x2d   : > { %p1813_p2 = pnand %p1811_p1, %p2090_p13 }
  0x2f   : > { %p1814_p6 = pneg %p1813_p2 }
  0x31   : > { %p1819_p3 = pnand %p1817_p10, %p1814_p6 }
  0x33   : > { %1822 = shalt.err (!%p1819_p3)
}
  0x34   : > { %s1823_s11 = scalar_lea.vmem %s2078_s14, 2048  ;;  %p1831_p12 = scmp.lt.s32.totalorder %s2078_s14, %s2078_s14 }
  0x35   : > { %p1824_p5 = scmp.ne.s32.totalorder %s2078_s14, %s1823_s11  ;;  %p1832_p0 = scmp.lt.s32.totalorder %s1823_s11, %s1823_s11 }
  0x37   : > { %p1826_p7 = pnand %p1824_p5, %p2090_p13  ;;  %p1833_p1 = por %p1832_p0, %p1831_p12 }
  0x39   : > { %p1827_p9 = pneg %p1826_p7 }
  0x3b   : > { %p1834_p2 = pnand %p1833_p1, %p1827_p9 }
  0x3d   : > { %1837 = shalt.err (!%p1834_p2)
}
  0x3e   : > { %1721 = dma.hbm_to_vmem [thread:$0]  (!%p2074_p11), %s2334_s3, 2048, %s2078_s14, [#allocation6], %s1975_s13, %s1975_s13, %s1976_s15  }
  0x3f   : > { %s1838_s20 = scalar_lea.hbm %s2336_s5, 2048 }
  0x40   : > { %p1839_p6 = scmp.ne.s32.totalorder %s2336_s5, %s1838_s20  ;;  %p1845_p5 = scmp.lt.u32.totalorder %s1838_s20, %s2336_s5 }
  0x42   : > { %p1841_p10 = pnand %p1839_p6, %p2090_p13 }
  0x44   : > { %p1842_p3 = pneg %p1841_p10 }
  0x46   : > { %p1847_p7 = pnand %p1845_p5, %p1842_p3 }
  0x48   : > { %1850 = shalt.err (!%p1847_p7)
}
  0x49   : > { %s1851_s11 = scalar_lea.vmem %s253_s16, 2048  ;;  %p1859_p1 = scmp.lt.s32.totalorder %s253_s16, %s253_s16 }
  0x4a   : > { %p1852_p9 = scmp.ne.s32.totalorder %s253_s16, %s1851_s11  ;;  %p1860_p2 = scmp.lt.s32.totalorder %s1851_s11, %s1851_s11 }
  0x4c   : > { %p1854_p12 = pnand %p1852_p9, %p2090_p13  ;;  %p1861_p4 = por %p1860_p2, %p1859_p1 }
  0x4e   : > { %p1855_p0 = pneg %p1854_p12 }
  0x50   : > { %p1862_p8 = pnand %p1861_p4, %p1855_p0 }
  0x52   : > { %1865 = shalt.err (!%p1862_p8)
}
  0x53   : > { %1724 = dma.hbm_to_vmem [thread:$0]  (!%p2074_p11), %s2336_s5, 2048, %s253_s16, [#allocation9], %s1975_s13, %s1975_s13, %s1976_s15  }
  0x54   : > { %s2163_s22 = sadd.s32 1, %s1970_s27   ;;  %s32_s17 = sadd.s32 1, %s1966_s26 }
  0x55   : > { %s29_s12 = ssub.s32 %s1970_s27, %s2163_s22  ;;  %p39_p8 = scmp.ne.s32.totalorder %s1966_s26, %s1962_s25 }
  0x56   : > { %p30_p4 = scmp.eq.s32.totalorder %s29_s12, 0  ;;  %p40_p13 = scmp.eq.s32.totalorder %s1970_s27, 0 }
  0x57   : > { %p1736_p6 = scmp.lt.s32.totalorder %s1970_s27, 2  ;;  %p2349_p3 = scmp.eq.s32.totalorder %s2044_s28, 1 }
  0x58   : > { %s2173_s18 = scalar_select %p30_p4, %s1966_s26, %s32_s17  }
  0x59   : > { %p41_p10 = por %p40_p13, %p39_p8  ;;  %p2177_p5 = por %p2349_p3, %p39_p8 }
  0x5a   : > { %s269_s20 = sand.u32 1, %s1966_s26   ;;  %s1697_s21 = smul.u32 3584, %s1970_s27 }
  0x5b   : > { %s1696_s16 = smul.u32 224, %s269_s20  ;;  %p2188_p11 = pnand %p1736_p6, %p41_p10 }
  0x5c   : > { %s2186_s23 = scalar_lea.hbm %s2331_s0, %s1697_s21  ;;  %s2194_s14 = scalar_lea.sflag [#allocation3], %s269_s20 }
  0x5d   : > { %s273_s10 = scalar_lea.vmem [#allocation2], %s1696_s16  ;;  %s1866_s8 = scalar_lea.hbm %s2186_s23, 3584 }
  0x5e   : > { %s281_s11 = sshll.u32 %s273_s10, 4  ;;  %p1867_p7 = scmp.ne.s32.totalorder %s2186_s23, %s1866_s8  ;;  %s2192_s11 = int_to_ptr.vmem [resolvable:$true] %s281_s11 }
  0x5f   : > { %p1868_p9 = pneg %p2188_p11  ;;  %s1871_s21 = scalar_lea.hbm %s2331_s0, 7168 }
  0x60   : > { %p1872_p1 = scmp.lt.u32.totalorder %s2186_s23, %s2331_s0  ;;  %p1873_p2 = scmp.lt.u32.totalorder %s1871_s21, %s1866_s8 }
  0x61   : > { %p1869_p12 = pnand %p1868_p9, %p1867_p7  ;;  %p1875_p8 = scmp.lt.u32.totalorder %s1866_s8, %s2186_s23 }
  0x62   : > { %p1874_p4 = por %p1873_p2, %p1872_p1 }
  0x63   : > { %p1870_p0 = pneg %p1869_p12 }
  0x64   : > { %p1876_p13 = por %p1875_p8, %p1874_p4 }
  0x66   : > { %p1877_p6 = pnand %p1876_p13, %p1870_p0 }
  0x68   : > { %1880 = shalt.err (!%p1877_p6)
}
  0x69   : > { %s1881_s20 = scalar_lea.vmem %s2192_s11, 3584  ;;  %s1977_s16 = smov [#allocation2]  }
  0x6a   : > { %p1882_p10 = scmp.ne.s32.totalorder %s2192_s11, %s1881_s20  ;;  %s1886_s10 = sshll.u32 %s1977_s16, 4  ;;  %s1887_s10 = int_to_ptr.vmem [resolvable:$false] %s1886_s10 }
  0x6b   : > { %s1888_s12 = scalar_lea.vmem %s1887_s10, 7168  ;;  %p1889_p12 = scmp.lt.s32.totalorder %s2192_s11, %s1887_s10 }
  0x6c   : > { %p1884_p3 = pnand %p1882_p10, %p1868_p9  ;;  %p1890_p1 = scmp.lt.s32.totalorder %s1888_s12, %s1881_s20 }
  0x6e   : > { %p1885_p7 = pneg %p1884_p3  ;;  %p1891_p2 = por %p1890_p1, %p1889_p12 }
  0x70   : > { %p1892_p4 = pnand %p1891_p2, %p1885_p7 }
  0x72   : > { %1895 = shalt.err (!%p1892_p4)
}
  0x73   : > { %s1978_s8 = smov 896   ;;  %s1979_s17 = smov 56  }
  0x74   : > { %1728 = dma.hbm_to_vmem [thread:$0]  (!%p2188_p11), %s2186_s23, 3584, %s2192_s11, %s2194_s14, %s1978_s8, %s1978_s8, %s1979_s17  }
  0x75   : > { %p2352_p9 = scmp.ne.s32.totalorder %s2346_s9, 0 }
  0x76   : > { %s2225_s21 = sand.u32 (!%p2352_p9), 1, %s1962_s25   ;;  %p2353_p0 = scmp.ne.s32.totalorder (!%p2352_p9), %s2343_s30, 0 }
  0x77   : > { %293 = sbr.rel (%p2352_p9) target bundleno = 882 (0x372), region = 48  ;;  %s296_s15 = scalar_lea.sflag (!%p2352_p9), [#allocation3], %s2225_s21 }
  0x78   : > { %s1698_s13 = smul.u32 (!%p2352_p9), 224, %s2225_s21 }
  0x7a   : > { %s2229_s20 = scalar_lea.vmem (!%p2352_p9), [#allocation2], %s1698_s13 }
  0x7e   : > { %1941 = dma.done.wait (%p2353_p0), %s296_s15, 3584  }
  0x7f   : > { %1943 = vsyncadd (%p2353_p0), %s296_s15, 4294963712  ;;  %p2354_p11 = scmp.eq.s32.totalorder %s2044_s28, 0 }
  0x81   : > { %1945 = dma.done.wait (%p2354_p11), [#allocation6], 16384   ;;  %p2355_p8 = pmov %p2354_p11 }
  0x83   : > { %1947 = vsyncadd (%p2355_p8), [#allocation6], 4294950912  ;;  %p2356_p13 = pmov %p2355_p8 }
  0x84   : > { %p2357_p6 = pmov %p2355_p8 }
  0x85   : > { %1949 = dma.done.wait (%p2356_p13), [#allocation9], 2048  }
  0x86   : > { %1951 = vsyncadd (%p2357_p6), [#allocation9], 4294965248  ;;  %v388_v0 = vld [vmem:[#allocation5 + $0x80] sm:$0xff]  ;;  %v389_v1 = vld [vmem:[#allocation5 + $0x88] sm:$0xff]  ;;  %s1188_s11 = sshll.u32 %s2225_s21, 5  ;;  %s1197_s8 = sshll.u32 %s2044_s28, 9 }
  0x87   : > { %v372_v2 = vld [vmem:[#allocation5] sm:$0xff]  ;;  %v1504_v3 = vpack.c.bf16 %v389_v1, %v388_v0  ;;  %v373_v4 = vld [vmem:[#allocation5 + $0x8] sm:$0xff]  ;;  %v390_v11 = vld [vmem:[#allocation5 + $0x90] sm:$0xff]  ;;  %s341_s10 = scalar_lea.vmem [#allocation10], %s1188_s11  ;;  %s2287_s15 = scalar_lea.hbm %s2338_s7, %s1197_s8 }
  0x88   : > { %v420_v5 = vld [vmem:[#allocation5 + $0x180] sm:$0xff]  ;;  %v421_v6 = vld [vmem:[#allocation5 + $0x188] sm:$0xff]  ;;  %v1506_v7 = vpack.c.bf16 %v373_v4, %v372_v2  ;;  %v391_v13 = vld [vmem:[#allocation5 + $0x98] sm:$0xff]  ;;  %s1073_s12 = sshll.u32 %s341_s10, 4  ;;  %s1980_s28 = smov [#allocation10]   ;;  %s2282_s12 = int_to_ptr.vmem [resolvable:$true] %s1073_s12 }
  0x89   : > { %v1536_v8 = vpack.c.bf16 %v421_v6, %v420_v5  ;;  %v404_v9 = vld [vmem:[#allocation5 + $0x100] sm:$0xff]  ;;  %v405_v10 = vld [vmem:[#allocation5 + $0x108] sm:$0xff]  ;;  %1505 = vmatprep.subr.bf16.mxu0 %v1504_v3  ;;  %v374_v14 = vld [vmem:[#allocation5 + $0x10] sm:$0xff]  ;;  %v1508_v16 = vpack.c.bf16 %v391_v13, %v390_v11  ;;  %s1896_s30 = scalar_lea.vmem %s2282_s12, 512  ;;  %s1900_s9 = sshll.u32 %s1980_s28, 4  ;;  %s1901_s9 = int_to_ptr.vmem [resolvable:$false] %s1900_s9 }
  0x8a   : > { %v1538_v12 = vpack.c.bf16 %v405_v10, %v404_v9  ;;  %v375_v15 = vld [vmem:[#allocation5 + $0x18] sm:$0xff]  ;;  %1507 = vmatpush3.bf16.msra.mxu0 %v1506_v7  ;;  %v422_v18 = vld [vmem:[#allocation5 + $0x190] sm:$0xff]  ;;  %v392_v23 = vld [vmem:[#allocation5 + $0xa0] sm:$0xff]  ;;  %p1897_p10 = scmp.ne.s32.totalorder %s2282_s12, %s1896_s30  ;;  %s1902_s23 = scalar_lea.vmem %s1901_s9, 1024 }
  0x8b   : > { %1537 = vmatprep.subr.bf16.mxu1 %v1536_v8  ;;  %v1510_v17 = vpack.c.bf16 %v375_v15, %v374_v14  ;;  %v423_v19 = vld [vmem:[#allocation5 + $0x198] sm:$0xff]  ;;  %v406_v20 = vld [vmem:[#allocation5 + $0x110] sm:$0xff]  ;;  %v393_v24 = vld [vmem:[#allocation5 + $0xa8] sm:$0xff]  ;;  %1509 = vmatprep.subr.bf16.mxu0 %v1508_v16  ;;  %p1903_p12 = scmp.lt.s32.totalorder %s2282_s12, %s1901_s9  ;;  %p1904_p1 = scmp.lt.s32.totalorder %s1902_s23, %s1896_s30 }
  0x8c   : > { %1539 = vmatpush3.bf16.msra.mxu1 %v1538_v12  ;;  %v1540_v21 = vpack.c.bf16 %v423_v19, %v422_v18  ;;  %v407_v22 = vld [vmem:[#allocation5 + $0x118] sm:$0xff]  ;;  %v1512_v26 = vpack.c.bf16 %v393_v24, %v392_v23  ;;  %v376_v27 = vld [vmem:[#allocation5 + $0x20] sm:$0xff]  ;;  %v377_v28 = vld [vmem:[#allocation5 + $0x28] sm:$0xff]  ;;  %p1898_p3 = pnand %p1897_p10, %p2177_p5 }
  0x8d   : > { %v1542_v25 = vpack.c.bf16 %v407_v22, %v406_v20  ;;  %v424_v29 = vld [vmem:[#allocation5 + $0x1a0] sm:$0xff]  ;;  %v425_v30 = vld [vmem:[#allocation5 + $0x1a8] sm:$0xff]  ;;  %v1514_v33 = vpack.c.bf16 %v377_v28, %v376_v27  ;;  %v394_v35 = vld [vmem:[#allocation5 + $0xb0] sm:$0xff]  ;;  %p1905_p2 = por %p1904_p1, %p1903_p12 }
  0x8e   : > { %1541 = vmatprep.subr.bf16.mxu1 %v1540_v21  ;;  %v408_v31 = vld [vmem:[#allocation5 + $0x120] sm:$0xff]  ;;  %v409_v32 = vld [vmem:[#allocation5 + $0x128] sm:$0xff]  ;;  %1511 = vmatpush3.bf16.msra.mxu0 %v1510_v17  ;;  %v1544_v34 = vpack.c.bf16 %v425_v30, %v424_v29  ;;  %v395_v36 = vld [vmem:[#allocation5 + $0xb8] sm:$0xff]  ;;  %p1899_p7 = pneg %p1898_p3 }
  0x8f   : > { %v378_v37 = vld [vmem:[#allocation5 + $0x30] sm:$0xff]  ;;  %1513 = vmatprep.subr.bf16.mxu0 %v1512_v26  ;;  %v1546_v38 = vpack.c.bf16 %v409_v32, %v408_v31  ;;  %v1516_v39 = vpack.c.bf16 %v395_v36, %v394_v35  ;;  %v379_v40 = vld [vmem:[#allocation5 + $0x38] sm:$0xff]  ;;  %v396_v46 = vld [vmem:[#allocation5 + $0xc0] sm:$0xff] }
  0x90   : > { %1543 = vmatpush3.bf16.msra.mxu1 %v1542_v25  ;;  %v426_v41 = vld [vmem:[#allocation5 + $0x1b0] sm:$0xff]  ;;  %v427_v42 = vld [vmem:[#allocation5 + $0x1b8] sm:$0xff]  ;;  %v397_v47 = vld [vmem:[#allocation5 + $0xc8] sm:$0xff]  ;;  %v1518_v48 = vpack.c.bf16 %v379_v40, %v378_v37  ;;  %p1906_p4 = pnand %p1905_p2, %p1899_p7 }
  0x91   : > { %1545 = vmatprep.subr.bf16.mxu1 %v1544_v34  ;;  %v1548_v43 = vpack.c.bf16 %v427_v42, %v426_v41  ;;  %v410_v44 = vld [vmem:[#allocation5 + $0x130] sm:$0xff]  ;;  %v411_v45 = vld [vmem:[#allocation5 + $0x138] sm:$0xff]  ;;  %v428_v49 = vld [vmem:[#allocation5 + $0x1c0] sm:$0xff]  ;;  %v1520_v52 = vpack.c.bf16 %v397_v47, %v396_v46 }
  0x92   : > { %1515 = vmatpush3.bf16.msra.mxu0 %v1514_v33  ;;  %v429_v50 = vld [vmem:[#allocation5 + $0x1c8] sm:$0xff]  ;;  %v1550_v51 = vpack.c.bf16 %v411_v45, %v410_v44  ;;  %v380_v53 = vld [vmem:[#allocation5 + $0x40] sm:$0xff]  ;;  %v398_v58 = vld [vmem:[#allocation5 + $0xd0] sm:$0xff] }
  0x93   : > { %1517 = vmatprep.subr.bf16.mxu0 %v1516_v39  ;;  %v381_v54 = vld [vmem:[#allocation5 + $0x48] sm:$0xff]  ;;  %v412_v55 = vld [vmem:[#allocation5 + $0x140] sm:$0xff]  ;;  %v1552_v56 = vpack.c.bf16 %v429_v50, %v428_v49  ;;  %v399_v59 = vld [vmem:[#allocation5 + $0xd8] sm:$0xff] }
  0x94   : > { %1547 = vmatpush3.bf16.msra.mxu1 %v1546_v38  ;;  %v413_v57 = vld [vmem:[#allocation5 + $0x148] sm:$0xff]  ;;  %v430_v60 = vld [vmem:[#allocation5 + $0x1d0] sm:$0xff]  ;;  %v431_v61 = vld [vmem:[#allocation5 + $0x1d8] sm:$0xff]  ;;  %v1522_v62 = vpack.c.bf16 %v381_v54, %v380_v53  ;;  %v1524_v0 = vpack.c.bf16 %v399_v59, %v398_v58 }
  0x95   : > { %1549 = vmatprep.subr.bf16.mxu1 %v1548_v43  ;;  %v1554_v63 = vpack.c.bf16 %v413_v57, %v412_v55  ;;  %v382_v1 = vld [vmem:[#allocation5 + $0x50] sm:$0xff]  ;;  %v383_v2 = vld [vmem:[#allocation5 + $0x58] sm:$0xff]  ;;  %v1556_v4 = vpack.c.bf16 %v431_v61, %v430_v60  ;;  %v400_v6 = vld [vmem:[#allocation5 + $0xe0] sm:$0xff] }
  0x96   : > { %1519 = vmatpush3.bf16.msra.mxu0 %v1518_v48  ;;  %v414_v3 = vld [vmem:[#allocation5 + $0x150] sm:$0xff]  ;;  %v415_v5 = vld [vmem:[#allocation5 + $0x158] sm:$0xff]  ;;  %v401_v7 = vld [vmem:[#allocation5 + $0xe8] sm:$0xff]  ;;  %v1526_v10 = vpack.c.bf16 %v383_v2, %v382_v1 }
  0x97   : > { %1521 = vmatprep.subr.bf16.mxu0 %v1520_v52  ;;  %v432_v8 = vld [vmem:[#allocation5 + $0x1e0] sm:$0xff]  ;;  %v433_v9 = vld [vmem:[#allocation5 + $0x1e8] sm:$0xff]  ;;  %v1558_v13 = vpack.c.bf16 %v415_v5, %v414_v3  ;;  %v1528_v14 = vpack.c.bf16 %v401_v7, %v400_v6  ;;  %v402_v19 = vld [vmem:[#allocation5 + $0xf0] sm:$0xff] }
  0x98   : > { %1551 = vmatpush3.bf16.msra.mxu1 %v1550_v51  ;;  %v384_v11 = vld [vmem:[#allocation5 + $0x60] sm:$0xff]  ;;  %v345_v12 = vld [vmem:[%s2229_s20 + $0x8] sm:$0xff]  ;;  %v1560_v18 = vpack.c.bf16 %v433_v9, %v432_v8  ;;  %v403_v20 = vld [vmem:[#allocation5 + $0xf8] sm:$0xff] }
  0x99   : > { %1553 = vmatprep.subr.bf16.mxu1 %v1552_v56  ;;  %v385_v15 = vld [vmem:[#allocation5 + $0x68] sm:$0xff]  ;;  %v416_v16 = vld [vmem:[#allocation5 + $0x160] sm:$0xff]  ;;  %555 = vmatprep.mubr.f32.mxu0 %v345_v12  ;;  %v347_v21 = vld [vmem:[%s2229_s20 + $0x18] sm:$0xff]  ;;  %v1532_v26 = vpack.c.bf16 %v403_v20, %v402_v19 }
  0x9a   : > { %1523 = vmatpush3.bf16.msra.mxu0 %v1522_v62  ;;  %v417_v17 = vld [vmem:[#allocation5 + $0x168] sm:$0xff]  ;;  %v434_v22 = vld [vmem:[#allocation5 + $0x1f0] sm:$0xff]  ;;  %v435_v23 = vld [vmem:[#allocation5 + $0x1f8] sm:$0xff]  ;;  %640 = vmatprep.mubr.f32.mxu1 %v347_v21  ;;  %v1530_v24 = vpack.c.bf16 %v385_v15, %v384_v11 }
  0x9b   : > { %1525 = vmatprep.subr.bf16.mxu0 %v1524_v0  ;;  %v1562_v25 = vpack.c.bf16 %v417_v17, %v416_v16  ;;  %v386_v27 = vld [vmem:[#allocation5 + $0x70] sm:$0xff]  ;;  %v387_v28 = vld [vmem:[#allocation5 + $0x78] sm:$0xff]  ;;  %v1564_v30 = vpack.c.bf16 %v435_v23, %v434_v22  ;;  %v452_v32 = vld [vmem:[#allocation5 + $0x280] sm:$0xff] }
  0x9c   : > { %1555 = vmatpush3.bf16.msra.mxu1 %v1554_v63  ;;  %v418_v29 = vld [vmem:[#allocation5 + $0x170] sm:$0xff]  ;;  %v419_v31 = vld [vmem:[#allocation5 + $0x178] sm:$0xff]  ;;  %v453_v33 = vld [vmem:[#allocation5 + $0x288] sm:$0xff]  ;;  %v1534_v36 = vpack.c.bf16 %v387_v28, %v386_v27 }
  0x9d   : > { %1557 = vmatprep.subr.bf16.mxu1 %v1556_v4  ;;  %v468_v34 = vld [vmem:[#allocation5 + $0x300] sm:$0xff]  ;;  %v469_v35 = vld [vmem:[#allocation5 + $0x308] sm:$0xff]  ;;  %v1566_v37 = vpack.c.bf16 %v419_v31, %v418_v29  ;;  %v1568_v38 = vpack.c.bf16 %v453_v33, %v452_v32  ;;  %v454_v41 = vld [vmem:[#allocation5 + $0x290] sm:$0xff] }
  0x9e   : > { %1527 = vmatpush3.bf16.msra.mxu0 %v1526_v10  ;;  %v436_v39 = vld [vmem:[#allocation5 + $0x200] sm:$0xff]  ;;  %v437_v40 = vld [vmem:[#allocation5 + $0x208] sm:$0xff]  ;;  %v455_v42 = vld [vmem:[#allocation5 + $0x298] sm:$0xff]  ;;  %v1600_v43 = vpack.c.bf16 %v469_v35, %v468_v34 }
  0x9f   : > { %1529 = vmatprep.subr.bf16.mxu0 %v1528_v14  ;;  %v470_v44 = vld [vmem:[#allocation5 + $0x310] sm:$0xff]  ;;  %v471_v45 = vld [vmem:[#allocation5 + $0x318] sm:$0xff]  ;;  %v344_v46 = vld [vmem:[%s2229_s20] sm:$0xff]  ;;  %v1570_v47 = vpack.c.bf16 %v437_v40, %v436_v39  ;;  %v1572_v49 = vpack.c.bf16 %v455_v42, %v454_v41 }
  0xa0   : > { %1559 = vmatpush3.bf16.msra.mxu1 %v1558_v13  ;;  %v346_v48 = vld [vmem:[%s2229_s20 + $0x10] sm:$0xff]  ;;  %v439_v51 = vld [vmem:[#allocation5 + $0x218] sm:$0xff]  ;;  %v456_v52 = vld [vmem:[#allocation5 + $0x2a0] sm:$0xff]  ;;  %v1604_v54 = vpack.c.bf16 %v471_v45, %v470_v44 }
  0xa1   : > { %1561 = vmatprep.subr.bf16.mxu1 %v1560_v18  ;;  %v438_v50 = vld [vmem:[#allocation5 + $0x210] sm:$0xff]  ;;  %v457_v53 = vld [vmem:[#allocation5 + $0x2a8] sm:$0xff]  ;;  %v472_v55 = vld [vmem:[#allocation5 + $0x320] sm:$0xff] }
  0xa2   : > { %1531 = vmatpush3.bf16.msra.mxu0 %v1530_v24  ;;  %v473_v56 = vld [vmem:[#allocation5 + $0x328] sm:$0xff]  ;;  %v352_v57 = vld [vmem:[%s2229_s20 + $0x40] sm:$0xff]  ;;  %v1574_v58 = vpack.c.bf16 %v439_v51, %v438_v50  ;;  %v351_v59 = vld [vmem:[%s2229_s20 + $0x38] sm:$0xff]  ;;  %v1576_v61 = vpack.c.bf16 %v457_v53, %v456_v52 }
  0xa3   : > { %1533 = vmatprep.subr.bf16.mxu0 %v1532_v26  ;;  %v354_v60 = vld [vmem:[%s2229_s20 + $0x50] sm:$0xff]  ;;  %v440_v62 = vld [vmem:[#allocation5 + $0x220] sm:$0xff]  ;;  %v441_v63 = vld [vmem:[#allocation5 + $0x228] sm:$0xff]  ;;  %v1608_v3 = vpack.c.bf16 %v473_v56, %v472_v55 }
  0xa4   : > { %1563 = vmatpush3.bf16.msra.mxu1 %v1562_v25  ;;  %v353_v0 = vld [vmem:[%s2229_s20 + $0x48] sm:$0xff]  ;;  %v458_v1 = vld [vmem:[#allocation5 + $0x2b0] sm:$0xff]  ;;  %v459_v2 = vld [vmem:[#allocation5 + $0x2b8] sm:$0xff]  ;;  %v1578_v7 = vpack.c.bf16 %v441_v63, %v440_v62 }
  0xa5   : > { %1565 = vmatprep.subr.bf16.mxu1 %v1564_v30  ;;  %v474_v4 = vld [vmem:[#allocation5 + $0x330] sm:$0xff]  ;;  %v475_v5 = vld [vmem:[#allocation5 + $0x338] sm:$0xff]  ;;  %v361_v9 = vld [vmem:[%s2229_s20 + $0x88] sm:$0xff]  ;;  %v1580_v10 = vpack.c.bf16 %v459_v2, %v458_v1 }
  0xa6   : > { %1535 = vmatpush3.bf16.msra.mxu0 %v1534_v36  ;;  %v359_v6 = vld [vmem:[%s2229_s20 + $0x78] sm:$0xff]  ;;  %v358_v8 = vld [vmem:[%s2229_s20 + $0x70] sm:$0xff]  ;;  %v360_v13 = vld [vmem:[%s2229_s20 + $0x80] sm:$0xff]  ;;  %v1612_v16 = vpack.c.bf16 %v475_v5, %v474_v4 }
  0xa7   : > { %1569 = vmatprep.subr.bf16.mxu0 %v1568_v38  ;;  %v442_v11 = vld [vmem:[#allocation5 + $0x230] sm:$0xff]  ;;  %v443_v12 = vld [vmem:[#allocation5 + $0x238] sm:$0xff]  ;;  %v460_v14 = vld [vmem:[#allocation5 + $0x2c0] sm:$0xff] }
  0xa8   : > { %1567 = vmatpush3.bf16.msra.mxu1 %v1566_v37  ;;  %v461_v15 = vld [vmem:[#allocation5 + $0x2c8] sm:$0xff]  ;;  %v476_v17 = vld [vmem:[#allocation5 + $0x340] sm:$0xff]  ;;  %v366_v19 = vld [vmem:[%s2229_s20 + $0xb0] sm:$0xff]  ;;  %v1582_v20 = vpack.c.bf16 %v443_v12, %v442_v11 }
  0xa9   : > { %1601 = vmatprep.subr.bf16.mxu1 %v1600_v43  ;;  %556 = vmatmul.mubr.f32.vlgmr.msra.gmra.mrb[0].mxu0 %v344_v46  ;;  %v477_v18 = vld [vmem:[#allocation5 + $0x348] sm:$0xff]  ;;  %v368_v22 = vld [vmem:[%s2229_s20 + $0xc0] sm:$0xff]  ;;  %v1584_v23 = vpack.c.bf16 %v461_v15, %v460_v14  ;;  %v367_v26 = vld [vmem:[%s2229_s20 + $0xb8] sm:$0xff] }
  0xaa   : > { %1571 = vmatpush3.bf16.msra.mxu0 %v1570_v47  ;;  %560 = vmatprep.mubr.f32.mxu0 %v352_v57  ;;  %v365_v21 = vld [vmem:[%s2229_s20 + $0xa8] sm:$0xff]  ;;  %v444_v24 = vld [vmem:[#allocation5 + $0x240] sm:$0xff]  ;;  %v462_v27 = vld [vmem:[#allocation5 + $0x2d0] sm:$0xff]  ;;  %v1616_v29 = vpack.c.bf16 %v477_v18, %v476_v17 }
  0xab   : > { %641 = vmatmul.mubr.f32.vlgmr.msra.gmra.mrb[0].mxu1 %v346_v48  ;;  %1573 = vmatprep.subr.bf16.mxu0 %v1572_v49  ;;  %v445_v25 = vld [vmem:[#allocation5 + $0x248] sm:$0xff]  ;;  %v463_v28 = vld [vmem:[#allocation5 + $0x2d8] sm:$0xff]  ;;  %v478_v30 = vld [vmem:[#allocation5 + $0x350] sm:$0xff] }
  0xac   : > { %1603 = vmatpush3.bf16.msra.mxu1 %v1600_v43  ;;  %645 = vmatprep.mubr.f32.mxu1 %v354_v60  ;;  %v479_v31 = vld [vmem:[#allocation5 + $0x358] sm:$0xff]  ;;  %v349_v32 = vld [vmem:[%s2229_s20 + $0x28] sm:$0xff]  ;;  %v1586_v33 = vpack.c.bf16 %v445_v25, %v444_v24  ;;  %v350_v34 = vld [vmem:[%s2229_s20 + $0x30] sm:$0xff]  ;;  %v1588_v35 = vpack.c.bf16 %v463_v28, %v462_v27 }
  0xad   : > { %1605 = vmatprep.subr.bf16.mxu1 %v1604_v54  ;;  %561 = vmatmul.mubr.f32.gmra.mrb[2].mxu0 %v351_v59  ;;  %v446_v36 = vld [vmem:[#allocation5 + $0x250] sm:$0xff]  ;;  %v447_v37 = vld [vmem:[#allocation5 + $0x258] sm:$0xff]  ;;  %v464_v38 = vld [vmem:[#allocation5 + $0x2e0] sm:$0xff]  ;;  %v1620_v40 = vpack.c.bf16 %v479_v31, %v478_v30 }
  0xae   : > { %1575 = vmatpush3.bf16.msra.mxu0 %v1574_v58  ;;  %565 = vmatprep.mubr.f32.mxu0 %v359_v6  ;;  %v465_v39 = vld [vmem:[#allocation5 + $0x2e8] sm:$0xff]  ;;  %v480_v41 = vld [vmem:[#allocation5 + $0x360] sm:$0xff]  ;;  %v1590_v43 = vpack.c.bf16 %v447_v37, %v446_v36  ;;  %v466_v47 = vld [vmem:[#allocation5 + $0x2f0] sm:$0xff] }
  0xaf   : > { %646 = vmatmul.mubr.f32.gmra.mrb[2].mxu1 %v353_v0  ;;  %1577 = vmatprep.subr.bf16.mxu0 %v1576_v61  ;;  %v481_v42 = vld [vmem:[#allocation5 + $0x368] sm:$0xff]  ;;  %v1592_v44 = vpack.c.bf16 %v465_v39, %v464_v38  ;;  %v448_v45 = vld [vmem:[#allocation5 + $0x260] sm:$0xff]  ;;  %v467_v48 = vld [vmem:[#allocation5 + $0x2f8] sm:$0xff] }
  0xb0   : > { %1607 = vmatpush3.bf16.msra.mxu1 %v1604_v54  ;;  %650 = vmatprep.mubr.f32.mxu1 %v361_v9  ;;  %v449_v46 = vld [vmem:[#allocation5 + $0x268] sm:$0xff]  ;;  %v1624_v49 = vpack.c.bf16 %v481_v42, %v480_v41  ;;  %v482_v50 = vld [vmem:[#allocation5 + $0x370] sm:$0xff]  ;;  %v483_v51 = vld [vmem:[#allocation5 + $0x378] sm:$0xff]  ;;  %v1596_v53 = vpack.c.bf16 %v467_v48, %v466_v47 }
  0xb1   : > { %1609 = vmatprep.subr.bf16.mxu1 %v1608_v3  ;;  %566 = vmatmul.mubr.f32.gmra.mrb[4].mxu0 %v358_v8  ;;  %v1594_v52 = vpack.c.bf16 %v449_v46, %v448_v45  ;;  %v450_v54 = vld [vmem:[#allocation5 + $0x270] sm:$0xff]  ;;  %v451_v55 = vld [vmem:[#allocation5 + $0x278] sm:$0xff]  ;;  %v1628_v56 = vpack.c.bf16 %v483_v51, %v482_v50  ;;  %v348_v58 = vld [vmem:[%s2229_s20 + $0x20] sm:$0xff] }
  0xb2   : > { %1579 = vmatpush3.bf16.msra.mxu0 %v1578_v7  ;;  %570 = vmatprep.mubr.f32.mxu0 %v366_v19  ;;  %v1598_v57 = vpack.c.bf16 %v451_v55, %v450_v54  ;;  %v356_v59 = vld [vmem:[%s2229_s20 + $0x60] sm:$0xff]  ;;  %v357_v60 = vld [vmem:[%s2229_s20 + $0x68] sm:$0xff]  ;;  %v355_v62 = vld [vmem:[%s2229_s20 + $0x58] sm:$0xff] }
  0xb3   : > { %651 = vmatmul.mubr.f32.gmra.mrb[4].mxu1 %v360_v13  ;;  %1581 = vmatprep.subr.bf16.mxu0 %v1580_v10  ;;  %v364_v61 = vld [vmem:[%s2229_s20 + $0xa0] sm:$0xff]  ;;  %v363_v63 = vld [vmem:[%s2229_s20 + $0x98] sm:$0xff]  ;;  %v362_v1 = vld [vmem:[%s2229_s20 + $0x90] sm:$0xff] }
  0xb4   : > { %1611 = vmatpush3.bf16.msra.mxu1 %v1608_v3  ;;  %655 = vmatprep.mubr.f32.mxu1 %v368_v22  ;;  %v371_v0 = vld [vmem:[%s2229_s20 + $0xd8] sm:$0xff]  ;;  %v370_v2 = vld [vmem:[%s2229_s20 + $0xd0] sm:$0xff]  ;;  %v369_v3 = vld [vmem:[%s2229_s20 + $0xc8] sm:$0xff]  ;;  %s1060_s20 = scalar_lea.sflag [#allocation4], %s2225_s21 }
  0xb5   : > { %1613 = vmatprep.subr.bf16.mxu1 %v1612_v16  ;;  %571 = vmatmul.mubr.f32.gmra.mrb[6].mxu0 %v365_v21  ;;  %v835_v4 = vld [vmem:[#allocation7] sm:$0xff]  ;;  %v836_v5 = vld [vmem:[#allocation7 + $0x8] sm:$0xff]  ;;  %v837_v6 = vld [vmem:[#allocation7 + $0x10] sm:$0xff] }
  0xb6   : > { %1583 = vmatpush3.bf16.msra.mxu0 %v1582_v20  ;;  %725 = vmatprep.mubr.f32.mxu0 %v349_v32  ;;  %v1632_v7 = vpack.c.bf16 %v836_v5, %v835_v4  ;;  %v838_v8 = vld [vmem:[#allocation7 + $0x18] sm:$0xff]  ;;  %v839_v10 = vld [vmem:[#allocation7 + $0x20] sm:$0xff]  ;;  %v840_v11 = vld [vmem:[#allocation7 + $0x28] sm:$0xff] }
  0xb7   : > { %656 = vmatmul.mubr.f32.gmra.mrb[6].mxu1 %v367_v26  ;;  %1585 = vmatprep.subr.bf16.mxu0 %v1584_v23  ;;  %v1636_v9 = vpack.c.bf16 %v838_v8, %v837_v6  ;;  %v1640_v12 = vpack.c.bf16 %v840_v11, %v839_v10  ;;  %v841_v13 = vld [vmem:[#allocation7 + $0x30] sm:$0xff]  ;;  %v842_v14 = vld [vmem:[#allocation7 + $0x38] sm:$0xff]  ;;  %v844_v17 = vld [vmem:[#allocation7 + $0x48] sm:$0xff] }
  0xb8   : > { %1615 = vmatpush3.bf16.msra.mxu1 %v1612_v16  ;;  %1422 = vmatprep.mubr.f32.mxu1 %v350_v34  ;;  %v1644_v15 = vpack.c.bf16 %v842_v14, %v841_v13  ;;  %v843_v16 = vld [vmem:[#allocation7 + $0x40] sm:$0xff]  ;;  %v845_v19 = vld [vmem:[#allocation7 + $0x50] sm:$0xff]  ;;  %v846_v20 = vld [vmem:[#allocation7 + $0x58] sm:$0xff] }
  0xb9   : > { %1617 = vmatprep.subr.bf16.mxu1 %v1616_v29  ;;  %v1648_v18 = vpack.c.bf16 %v844_v17, %v843_v16  ;;  %v1652_v21 = vpack.c.bf16 %v846_v20, %v845_v19  ;;  %v847_v22 = vld [vmem:[#allocation7 + $0x60] sm:$0xff]  ;;  %v848_v23 = vld [vmem:[#allocation7 + $0x68] sm:$0xff]  ;;  %v849_v25 = vld [vmem:[#allocation7 + $0x70] sm:$0xff] }
  0xba   : > { %1587 = vmatpush3.bf16.msra.mxu0 %v1586_v33  ;;  %v1656_v24 = vpack.c.bf16 %v848_v23, %v847_v22  ;;  %v850_v26 = vld [vmem:[#allocation7 + $0x78] sm:$0xff]  ;;  %v947_v28 = vld [vmem:[#allocation8] sm:$0xff]  ;;  %v949_v30 = vld [vmem:[#allocation8 + $0x10] sm:$0xff] }
  0xbb   : > { %1589 = vmatprep.subr.bf16.mxu0 %v1588_v35  ;;  %v1660_v27 = vpack.c.bf16 %v850_v26, %v849_v25  ;;  %v950_v32 = vld [vmem:[#allocation8 + $0x18] sm:$0xff]  ;;  %v951_v34 = vld [vmem:[#allocation8 + $0x20] sm:$0xff]  ;;  %v952_v35 = vld [vmem:[#allocation8 + $0x28] sm:$0xff] }
  0xbc   : > { %1619 = vmatpush3.bf16.msra.mxu1 %v1616_v29  ;;  %v948_v29 = vld [vmem:[#allocation8 + $0x8] sm:$0xff]  ;;  %v1668_v33 = vpack.c.bf16 %v950_v32, %v949_v30  ;;  %v1672_v36 = vpack.c.bf16 %v952_v35, %v951_v34  ;;  %v953_v37 = vld [vmem:[#allocation8 + $0x30] sm:$0xff]  ;;  %v954_v38 = vld [vmem:[#allocation8 + $0x38] sm:$0xff] }
  0xbd   : > { %1621 = vmatprep.subr.bf16.mxu1 %v1620_v40  ;;  %v1664_v31 = vpack.c.bf16 %v948_v29, %v947_v28  ;;  %v1676_v39 = vpack.c.bf16 %v954_v38, %v953_v37  ;;  %v956_v41 = vld [vmem:[#allocation8 + $0x48] sm:$0xff]  ;;  %v959_v46 = vld [vmem:[#allocation8 + $0x60] sm:$0xff] }
  0xbe   : > { %1591 = vmatpush3.bf16.msra.mxu0 %v1590_v43  ;;  %v957_v43 = vld [vmem:[#allocation8 + $0x50] sm:$0xff]  ;;  %v960_v47 = vld [vmem:[#allocation8 + $0x68] sm:$0xff]  ;;  %v1189_v50 = vld [vmem:[%s2333_s2] ss:$0 sm:$0xff] }
  0xbf   : > { %1593 = vmatprep.subr.bf16.mxu0 %v1592_v44  ;;  %v958_v44 = vld [vmem:[#allocation8 + $0x58] sm:$0xff]  ;;  %v1688_v48 = vpack.c.bf16 %v960_v47, %v959_v46  ;;  %v961_v46 = vld [vmem:[#allocation8 + $0x70] sm:$0xff] }
  0xc0   : > { %1623 = vmatpush3.bf16.msra.mxu1 %v1620_v40  ;;  %v955_v40 = vld [vmem:[#allocation8 + $0x40] sm:$0xff]  ;;  %v1684_v45 = vpack.c.bf16 %v958_v44, %v957_v43  ;;  %v962_v47 = vld [vmem:[#allocation8 + $0x78] sm:$0xff] }
  0xc1   : > { %1625 = vmatprep.subr.bf16.mxu1 %v1624_v49  ;;  %v1680_v42 = vpack.c.bf16 %v956_v41, %v955_v40 }
  0xc2   : > { %1595 = vmatpush3.bf16.msra.mxu0 %v1594_v52 }
  0xc3   : > { %1597 = vmatprep.subr.bf16.mxu0 %v1596_v53 }
  0xc4   : > { %1627 = vmatpush3.bf16.msra.mxu1 %v1624_v49 }
  0xc5   : > { %1629 = vmatprep.subr.bf16.mxu1 %v1628_v56 }
  0xc6   : > { %1599 = vmatpush3.bf16.msra.mxu0 %v1598_v57 }
  0xc7   : > { %1633 = vmatprep.subr.bf16.mxu0 %v1632_v7 }
  0xc8   : > { %1631 = vmatpush3.bf16.msra.mxu1 %v1628_v56 }
  0xc9   : > { %726 = vmatmul.mubr.f32.vlgmr.msra.gmra.mrb[8].mxu0 %v348_v58  ;;  %1665 = vmatprep.subr.bf16.mxu1 %v1664_v31 }
  0xca   : > { %730 = vmatprep.mubr.f32.mxu0 %v356_v59  ;;  %1635 = vmatpush3.bf16.msra.mxu0 %v1632_v7 }
  0xcb   : > { %1423 = vmatmul.mubr.f32.vlgmr.msra.gmra.mrb[8].mxu1 %v357_v60  ;;  %1637 = vmatprep.subr.bf16.mxu0 %v1636_v9 }
  0xcc   : > { %1425 = vmatprep.mubr.f32.mxu1 %v364_v61  ;;  %1667 = vmatpush3.bf16.msra.mxu1 %v1664_v31 }
  0xcd   : > { %731 = vmatmul.mubr.f32.gmra.mrb[10].mxu0 %v355_v62  ;;  %1669 = vmatprep.subr.bf16.mxu1 %v1668_v33 }
  0xce   : > { %735 = vmatprep.mubr.f32.mxu0 %v363_v63  ;;  %1639 = vmatpush3.bf16.msra.mxu0 %v1636_v9 }
  0xcf   : > { %1426 = vmatmul.mubr.f32.gmra.mrb[10].mxu1 %v371_v0  ;;  %1641 = vmatprep.subr.bf16.mxu0 %v1640_v12 }
  0xd0   : > { %1671 = vmatpush3.bf16.msra.mxu1 %v1668_v33 }
  0xd1   : > { %736 = vmatmul.mubr.f32.gmra.mrb[12].mxu0 %v362_v1  ;;  %1673 = vmatprep.subr.bf16.mxu1 %v1672_v36 }
  0xd2   : > { %740 = vmatprep.mubr.f32.mxu0 %v370_v2  ;;  %1643 = vmatpush3.bf16.msra.mxu0 %v1640_v12 }
  0xd3   : > { %1645 = vmatprep.subr.bf16.mxu0 %v1644_v15 }
  0xd4   : > { %1675 = vmatpush3.bf16.msra.mxu1 %v1672_v36 }
  0xd5   : > { %741 = vmatmul.mubr.f32.gmra.mrb[14].mxu0 %v369_v3  ;;  %1677 = vmatprep.subr.bf16.mxu1 %v1676_v39 }
  0xd6   : > { %1647 = vmatpush3.bf16.msra.mxu0 %v1644_v15 }
  0xd7   : > { %1649 = vmatprep.subr.bf16.mxu0 %v1648_v18 }
  0xd8   : > { %1679 = vmatpush3.bf16.msra.mxu1 %v1676_v39 }
  0xd9   : > { %1681 = vmatprep.subr.bf16.mxu1 %v1680_v42 }
  0xda   : > { %1651 = vmatpush3.bf16.msra.mxu0 %v1648_v18 }
  0xdb   : > { %1653 = vmatprep.subr.bf16.mxu0 %v1652_v21 }
  0xdc   : > { %1683 = vmatpush3.bf16.msra.mxu1 %v1680_v42 }
  0xdd   : > { %1685 = vmatprep.subr.bf16.mxu1 %v1684_v45 }
  0xde   : > { %1655 = vmatpush3.bf16.msra.mxu0 %v1652_v21 }
  0xdf   : > { %1657 = vmatprep.subr.bf16.mxu0 %v1656_v24 }
  0xe0   : > { %1687 = vmatpush3.bf16.msra.mxu1 %v1684_v45 }
  0xe1   : > { %1689 = vmatprep.subr.bf16.mxu1 %v1688_v48 }
  0xe2   : > { %1659 = vmatpush3.bf16.msra.mxu0 %v1656_v24 }
  0xe3   : > { %1661 = vmatprep.subr.bf16.mxu0 %v1660_v27 }
  0xe4   : > { %1691 = vmatpush3.bf16.msra.mxu1 %v1688_v48  ;;  %v1692_v48 = vpack.c.bf16 %v962_v47, %v961_v46 }
  0xe6   : > { %1663 = vmatpush3.bf16.msra.mxu0 %v1660_v27  ;;  %1693 = vmatprep.subr.bf16.mxu1 %v1692_v48 }
  0xe8   : > { %1695 = vmatpush3.bf16.msra.mxu1 %v1692_v48 }
 0x17c   : > { %v1230_v49 = vpop.f32.mrb[0].mxu0 }
 0x17d   : > { %v1231_v51 = vpop.f32.mrb[1].mxu0 }
 0x17e   : > { %v1274_v52 = vpop.f32.mrb[0].mxu1  ;;  %v1232_v53 = vadd.f32 %v1231_v51, %v1230_v49  ;;  %v1190_v49 = vld [vmem:[%s2335_s4] ss:$0 sm:$0xff] }
 0x17f   : > { %v1275_v54 = vpop.f32.mrb[1].mxu1 }
 0x180   : > { %v1276_v55 = vadd.f32 %v1275_v54, %v1274_v52  ;;  %v558_v56 = vadd.f32 %v1232_v53, %v1189_v50  ;;  %v1233_v57 = vpop.f32.mrb[2].mxu0 }
 0x181   : > { %v1234_v58 = vpop.f32.mrb[3].mxu0 }
 0x182   : > { %v1277_v59 = vpop.f32.mrb[2].mxu1  ;;  %v643_v60 = vadd.f32 %v1276_v55, %v558_v56  ;;  %v1235_v61 = vadd.f32 %v1234_v58, %v1233_v57 }
 0x183   : > { %v1278_v62 = vpop.f32.mrb[3].mxu1 }
 0x184   : > { %v1279_v63 = vadd.f32 %v1278_v62, %v1277_v59  ;;  %v563_v0 = vadd.f32 %v1235_v61, %v1189_v50  ;;  %v1236_v1 = vpop.f32.mrb[4].mxu0  ;;  %v1191_v62 = vld [vmem:[%s2337_s6] ss:$0 sm:$0xff] }
 0x185   : > { %v1237_v2 = vpop.f32.mrb[5].mxu0 }
 0x186   : > { %v1280_v3 = vpop.f32.mrb[4].mxu1  ;;  %v648_v4 = vadd.f32 %v1279_v63, %v563_v0  ;;  %v1238_v5 = vadd.f32 %v1237_v2, %v1236_v1 }
 0x187   : > { %v1281_v6 = vpop.f32.mrb[5].mxu1 }
 0x188   : > { %v1282_v7 = vadd.f32 %v1281_v6, %v1280_v3  ;;  %v568_v8 = vadd.f32 %v1238_v5, %v1189_v50  ;;  %v1239_v9 = vpop.f32.mrb[6].mxu0 }
 0x189   : > { %v1240_v10 = vpop.f32.mrb[7].mxu0 }
 0x18a   : > { %v1283_v11 = vpop.f32.mrb[6].mxu1  ;;  %v653_v12 = vadd.f32 %v1282_v7, %v568_v8  ;;  %v1241_v13 = vadd.f32 %v1240_v10, %v1239_v9 }
 0x18b   : > { %v1284_v14 = vpop.f32.mrb[7].mxu1 }
 0x18c   : > { %v1285_v15 = vadd.f32 %v1284_v14, %v1283_v11  ;;  %v573_v16 = vadd.f32 %v1241_v13, %v1189_v50 }
 0x18e   : > { %v658_v17 = vadd.f32 %v1285_v15, %v573_v16 }
 0x19c   : > { %v1318_v18 = vpop.f32.mrb[8].mxu0 }
 0x19d   : > { %v1319_v19 = vpop.f32.mrb[9].mxu0 }
 0x19e   : > { %v1424_v20 = vpop.f32.mrb[8].mxu1  ;;  %v1320_v21 = vadd.f32 %v1319_v19, %v1318_v18 }
 0x19f   : > { %v812_v22 = vpop.f32.mrb[9].mxu1 }
 0x1a0   : > { %v1321_v23 = vpop.f32.mrb[10].mxu0  ;;  %v728_v24 = vadd.f32 %v1320_v21, %v643_v60 }
 0x1a1   : > { %v1322_v25 = vpop.f32.mrb[11].mxu0 }
 0x1a2   : > { %v1427_v26 = vpop.f32.mrb[10].mxu1  ;;  %v1323_v27 = vadd.f32 %v1322_v25, %v1321_v23  ;;  %v813_v28 = vadd.f32 %v812_v22, %v728_v24 }
 0x1a3   : > { %v822_v29 = vpop.f32.mrb[11].mxu1 }
 0x1a4   : > { %v733_v30 = vadd.f32 %v1323_v27, %v648_v4  ;;  %v831_v31 = vmax.f32 %v813_v28, 0.0  ;;  %v1324_v32 = vpop.f32.mrb[12].mxu0 }
 0x1a5   : > { %v1325_v33 = vpop.f32.mrb[13].mxu0 }
 0x1a6   : > { %v818_v34 = vadd.f32 %v1424_v20, %v733_v30  ;;  %v1326_v35 = vadd.f32 %v1325_v33, %v1324_v32  ;;  %1460 = vmatprep.mubr.f32.mxu0 %v831_v31 }
 0x1a8   : > { %v832_v36 = vmax.f32 %v818_v34, 0.0  ;;  %v1327_v37 = vpop.f32.mrb[14].mxu0  ;;  %v738_v38 = vadd.f32 %v1326_v35, %v653_v12 }
 0x1a9   : > { %v1328_v39 = vpop.f32.mrb[15].mxu0 }
 0x1aa   : > { %v1329_v40 = vadd.f32 %v1328_v39, %v1327_v37  ;;  %v823_v41 = vadd.f32 %v822_v29, %v738_v38  ;;  %1461 = vmatmul.mubr.f32.vlgmr.msra.gmra.mrb[16].mxu0 %v832_v36 }
 0x1ac   : > { %v743_v42 = vadd.f32 %v1329_v40, %v658_v17  ;;  %v833_v43 = vmax.f32 %v823_v41, 0.0 }
 0x1ae   : > { %1463 = vmatprep.mubr.f32.mxu0 %v833_v43  ;;  %v828_v44 = vadd.f32 %v1427_v26, %v743_v42 }
 0x1b0   : > { %v834_v45 = vmax.f32 %v828_v44, 0.0 }
 0x1b2   : > { %1464 = vmatmul.mubr.f32.gmra.mrb[18].mxu0 %v834_v45 }
 0x27d   : > { %v1462_v50 = vpop.f32.mrb[16].mxu0 }
 0x27e   : > { %v930_v51 = vadd.f32 %v1462_v50, %v1190_v49  ;;  %v924_v52 = vpop.f32.mrb[17].mxu0 }
 0x27f   : > { %v925_v53 = vadd.f32 %v1190_v49, %v924_v52 }
 0x280   : > { %v944_v55 = vmax.f32 %v930_v51, 0.0 }
 0x281   : > { %v943_v54 = vmax.f32 %v925_v53, 0.0 }
 0x283   : > { %1498 = vmatprep.mubr.f32.mxu1 %v943_v54 }
 0x284   : > { %1499 = vmatmul.mubr.f32.vlgmr.msra.gmra.mrb[12].mxu1 %v944_v55 }
 0x285   : > { %v1465_v56 = vpop.f32.mrb[18].mxu0 }
 0x286   : > { %v940_v57 = vadd.f32 %v1465_v56, %v1190_v49  ;;  %v934_v58 = vpop.f32.mrb[19].mxu0 }
 0x287   : > { %v935_v59 = vadd.f32 %v1190_v49, %v934_v58 }
 0x288   : > { %v946_v61 = vmax.f32 %v940_v57, 0.0 }
 0x289   : > { %v945_v60 = vmax.f32 %v935_v59, 0.0 }
 0x28b   : > { %1501 = vmatprep.mubr.f32.mxu1 %v945_v60 }
 0x28c   : > { %1502 = vmatmul.mubr.f32.gmra.mrb[14].mxu1 %v946_v61 }
 0x357   : > { %v1500_v63 = vpop.f32.mrb[12].mxu1 }
 0x358   : > { %v1042_v0 = vadd.f32 %v1500_v63, %v1191_v62  ;;  %v1036_v1 = vpop.f32.mrb[13].mxu1 }
 0x359   : > { %v1037_v2 = vadd.f32 %v1191_v62, %v1036_v1 }
 0x35a   : > { %1056 = vst [vmem:[%s341_s10 + $0x8] sm:$0xff] %v1042_v0 }
 0x35b   : > { %1055 = vst [vmem:[%s341_s10] sm:$0xff] %v1037_v2 }
 0x35f   : > { %v1503_v3 = vpop.f32.mrb[14].mxu1 }
 0x360   : > { %v1052_v4 = vadd.f32 %v1503_v3, %v1191_v62  ;;  %v1046_v5 = vpop.f32.mrb[15].mxu1 }
 0x361   : > { %v1047_v6 = vadd.f32 %v1191_v62, %v1046_v5 }
 0x362   : > { %1058 = vst [vmem:[%s341_s10 + $0x18] sm:$0xff] %v1052_v4 }
 0x363   : > { %1057 = vst [vmem:[%s341_s10 + $0x10] sm:$0xff] %v1047_v6 }
 0x364   : > { %1909 = shalt.err (!%p1906_p4)
}
 0x365   : > { %s1910_s29 = scalar_lea.hbm %s2287_s15, 512  ;;  %s1914_s16 = scalar_lea.hbm %s2338_s7, 1024 }
 0x366   : > { %p1911_p9 = scmp.ne.s32.totalorder %s2287_s15, %s1910_s29  ;;  %p1915_p8 = scmp.lt.u32.totalorder %s2287_s15, %s2338_s7 }
 0x367   : > { %p1916_p13 = scmp.lt.u32.totalorder %s1914_s16, %s1910_s29  ;;  %p1918_p10 = scmp.lt.u32.totalorder %s1910_s29, %s2287_s15 }
 0x368   : > { %p1912_p0 = pnand %p1911_p9, %p2177_p5 }
 0x369   : > { %p1917_p6 = por %p1916_p13, %p1915_p8 }
 0x36a   : > { %p1913_p11 = pneg %p1912_p0 }
 0x36b   : > { %p1919_p3 = por %p1918_p10, %p1917_p6 }
 0x36d   : > { %p1920_p7 = pnand %p1919_p3, %p1913_p11 }
 0x36f   : > { %1923 = shalt.err (!%p1920_p7)
}
 0x370   : > { %s1981_s17 = smov 128   ;;  %s1982_s13 = smov 8  }
 0x371   : > { %1713 = dma.vmem_to_hbm [thread:$0]  (%p2177_p5), %s2282_s12, 512, %s2287_s15, %s1060_s20, %s1981_s17, %s1981_s17, %s1982_s13  }
 0x372 PF: > { %s2358_s30 = sld [smem:[#allocation15_spill]]  ;;  %s1088_s28 = sand.u32 1, %s1958_s24  }
 0x373   : > { %p2360_p1 = scmp.ge.s32.totalorder %s1970_s27, 2  ;;  %s1089_s9 = scalar_lea.sflag [#allocation4], %s1088_s28 }
 0x378   : > { %p2359_p12 = scmp.ne.s32.totalorder %s2358_s30, 0 }
 0x37a   : > { %p1730_p2 = pnand %p2360_p1, %p2359_p12 }
 0x37c   : > { %1953 = dma.done.wait (!%p1730_p2), %s1089_s9, 512  }
 0x37d   : > { %1955 = vsyncadd (!%p1730_p2), %s1089_s9, 4294966784  ;;  %p22_p4 = scmp.ge.s32.totalorder %s2163_s22, 4   ;;  %s2361_s24 = smov %s1962_s25 }
 0x37e   : > { %s2362_s25 = smov %s1966_s26  ;;  %s2363_s26 = smov %s2173_s18 }
 0x37f   : > { %s2364_s27 = smov %s2163_s22  ;;  %24 = sbr.rel (!%p22_p4) target bundleno = 7 (0x7), region = 105 }
 0x386   :  { %1094 = vsyncpa [#allocation3], 1 }
 0x387   :  { %1096 = vsyncpa [#allocation3 + $0x1], 1 }
 0x388   :  { %1097 = vsyncpa [#allocation6], 1 }
 0x389   :  { %1098 = vsyncpa [#allocation9], 1 }
 0x38a   :  { %1099 = vsyncpa [#allocation4], 1 }
 0x38b   :  { %1101 = vsyncpa [#allocation4 + $0x1], 1 }

</bundles_post_ra>
